<compile_context>
chip_gen: v6e
topology: v6e:2x2x1
jax: 0.10.0
libtpu: 0.0.40
codegen_flags: <defaults>
</compile_context>

<pallas_src>
import functools
import math

import jax
import jax.numpy as jnp
import numpy as np
from jax import lax
from jax.experimental import pallas as pl
from jax.experimental.pallas import tpu as pltpu
from jax.scipy.special import erf as _erf_exact


# ---------------------------------------------------------------------------
# helpers
# ---------------------------------------------------------------------------
def _erf_poly(x):
    # Abramowitz & Stegun 7.1.26 rational approximation, |err| < 1.5e-7.
    # Only mul/add/exp plus an EUP-approx reciprocal, so it lowers cleanly in
    # Mosaic and matches torch.erf far below bf16 precision.
    p = 0.3275911
    a1, a2, a3, a4, a5 = (0.254829592, -0.284496736, 1.421413741,
                          -1.453152027, 1.061405429)
    ax = jnp.abs(x)
    t = pl.reciprocal(1.0 + p * ax, approx=True)
    poly = t * (a1 + t * (a2 + t * (a3 + t * (a4 + t * a5))))
    y = 1.0 - poly * jnp.exp(-ax * ax)
    return jnp.where(x >= 0, y, -y)


def _gelu(x):
    # Original BERT gelu: x * 0.5 * (1 + erf(x / sqrt(2)))
    # TODO(synk): on v6e/v7x the tanh-approximate gelu would move the
    # polynomial off the VALU slot, but it deviates from torch.erf semantics.
    return 0.5 * x * (1.0 + _erf_poly(x * (1.0 / math.sqrt(2.0))))


def _layer_norm(y, gamma, beta, eps):
    mean = jnp.mean(y, axis=-1, keepdims=True)
    var = jnp.mean(jnp.square(y - mean), axis=-1, keepdims=True)
    return (y - mean) * jax.lax.rsqrt(var + eps) * gamma + beta


# ---------------------------------------------------------------------------
# kernel
# ---------------------------------------------------------------------------
def _bert_layer_kernel(x_ref, mask_ref,
                       wq_ref, bq_ref, wkv_ref, bkv_ref,
                       wo_ref, bo_ref, g1_ref, be1_ref,
                       wi_ref, bi_ref, wo2_ref, bo2_ref, g2_ref, be2_ref,
                       o_ref,
                       q_s, k_s, v_s, ctx_s,
                       *, num_heads, head_dim, hidden, tq, head_group, eps):
    f32 = jnp.float32
    qt = pl.program_id(1)

    # --- fused K|V projection once per batch element, cached in VMEM scratch
    @pl.when(qt == 0)
    def _():
        x_all = x_ref[...]                                            # (S, H) bf16
        kv = (jnp.dot(x_all, wkv_ref[...], preferred_element_type=f32)
              + bkv_ref[...])                                         # (S, 2H) f32
        k_s[...] = kv[:, :hidden].astype(k_s.dtype)
        v_s[...] = kv[:, hidden:].astype(v_s.dtype)

    # --- Q projection for this query tile (1/sqrt(d) folded into Q) ---------
    q_start = pl.multiple_of(qt * tq, tq)
    xq = x_ref[pl.ds(q_start, tq), :]                                 # (tq, H) bf16
    scale = 1.0 / math.sqrt(head_dim)
    q = (jnp.dot(xq, wq_ref[...], preferred_element_type=f32)
         + bq_ref[...]) * scale
    q_s[...] = q.astype(q_s.dtype)

    # Hoisted (1,S)->(tq,S) mask broadcast (JAX does not CSE broadcast_in_dim).
    mask_b = jnp.broadcast_to(mask_ref[...], (tq, mask_ref.shape[-1]))  # (tq,S) f32

    # --- per-head attention; heads grouped so ctx stores are lane-dense -----
    for g in range(num_heads // head_group):                          # static loops
        parts = []
        for hh in range(head_group):
            h = g * head_group + hh
            sl = slice(h * head_dim, (h + 1) * head_dim)
            qh = q_s[:, sl]                                           # (tq, hd) bf16
            kh = k_s[:, sl]                                           # (S,  hd) bf16
            vh = v_s[:, sl]                                           # (S,  hd) bf16
            # qh @ kh.T via dot_general (no explicit transpose).
            scores = lax.dot_general(
                qh, kh, (((1,), (1,)), ((), ())),
                preferred_element_type=f32) + mask_b                  # (tq, S) f32
            scores = scores - jnp.max(scores, axis=-1, keepdims=True)
            p = jnp.exp(scores)
            inv_denom = pl.reciprocal(jnp.sum(p, axis=-1, keepdims=True),
                                      approx=True)
            ctx_h = jnp.dot(p.astype(vh.dtype), vh,
                            preferred_element_type=f32) * inv_denom   # (tq, hd)
            parts.append(ctx_h)
        ctx_g = parts[0] if head_group == 1 else jnp.concatenate(parts, axis=-1)
        gsl = slice(g * head_group * head_dim, (g + 1) * head_group * head_dim)
        ctx_s[:, gsl] = ctx_g.astype(ctx_s.dtype)

    # --- BertSelfOutput: dense -> (+residual) -> LayerNorm -------------------
    attn = (jnp.dot(ctx_s[...], wo_ref[...], preferred_element_type=f32)
            + bo_ref[...])
    y1 = _layer_norm(attn + xq.astype(f32), g1_ref[...], be1_ref[...], eps)

    # --- BertIntermediate: dense -> gelu -------------------------------------
    # TODO(synk): for very large I / tq on v7x, tile the FFN over the
    # intermediate dimension instead of materializing the full (tq, I) slab.
    inter = (jnp.dot(y1.astype(wi_ref.dtype), wi_ref[...],
                     preferred_element_type=f32) + bi_ref[...])
    inter = _gelu(inter)

    # --- BertOutput: dense -> (+residual) -> LayerNorm ------------------------
    out = (jnp.dot(inter.astype(wo2_ref.dtype), wo2_ref[...],
                   preferred_element_type=f32) + bo2_ref[...])
    y2 = _layer_norm(out + y1, g2_ref[...], be2_ref[...], eps)

    o_ref[...] = y2.astype(o_ref.dtype)


# ---------------------------------------------------------------------------
# wrapper
# ---------------------------------------------------------------------------
def _pick_q_tile(S, target):
    divs = [d for d in range(1, S + 1) if S % d == 0 and d <= max(1, target)]
    # prefer sublane-aligned tiles unless the tile is the full sequence
    aligned = [d for d in divs if d == S or d % 8 == 0]
    cands = aligned if aligned else divs
    return max(cands)


def _estimate_vmem_bytes(S, H, I, tq, *, wbytes, out_bytes, single_weights):
    wb = 1 if single_weights else 2
    weights = wb * wbytes * (4 * H * H + 2 * H * I)   # Wq, Wk|Wv, Wo, Wi, Wo2
    small = wb * 4 * (9 * H + I)                      # biases + LayerNorm affine
    x_blk = 2 * wbytes * S * H                        # double-buffered x block
    mask_blk = 2 * 4 * S
    out_blk = 2 * out_bytes * tq * H
    scratch = wbytes * (2 * tq * H + 2 * S * H)       # Q, ctx, K, V caches
    temps = 4 * tq * (I + 2 * S + 6 * H)              # scores / inter / LN temps
    return weights + small + x_blk + mask_blk + out_blk + scratch + temps


def bert_layer(x, attention_mask, params, *, num_heads, eps=1e-12,
               q_tile=None, compute_dtype=jnp.bfloat16):
    B, S, H = x.shape
    assert H % num_heads == 0
    head_dim = H // num_heads
    I = params["wi"].shape[1]

    if attention_mask is None:
        attention_mask = jnp.zeros((B, 1, S), jnp.float32)
    attention_mask = attention_mask.astype(jnp.float32)

    # --- device-aware VMEM budget --------------------------------------------
    try:
        phys_vmem = int(pltpu.get_tpu_info().vmem_capacity_bytes)
    except Exception:
        phys_vmem = 64 * 1024 * 1024        # conservative (v7x per-core VMEM)
    vmem_cap = min(phys_vmem * 3 // 4, 100 * 1024 * 1024)

    wbytes = jnp.dtype(compute_dtype).itemsize
    out_bytes = jnp.dtype(x.dtype).itemsize

    # --- q-tile: largest divisor of S <= target that fits the VMEM budget ----
    target = 512 if q_tile is None else q_tile
    qt_sz = _pick_q_tile(S, target)
    while (_estimate_vmem_bytes(S, H, I, qt_sz, wbytes=wbytes,
                                out_bytes=out_bytes, single_weights=True)
           > vmem_cap and qt_sz > 8):
        new_qt = _pick_q_tile(S, qt_sz // 2)
        if new_qt == qt_sz:
            break
        qt_sz = new_qt
    n_qt = S // qt_sz

    # heads processed in groups so ctx stores are >=128 lanes when head_dim<128
    hg_target = max(1, 128 // head_dim)
    head_group = 1
    for g in range(1, min(num_heads, hg_target) + 1):
        if num_heads % g == 0:
            head_group = g

    # bf16 MXU operands, f32 "small" params (biases / LayerNorm affine).
    f32 = jnp.float32
    x_c = x.astype(compute_dtype)
    wq = params["wq"].astype(compute_dtype)
    wkv = jnp.concatenate([params["wk"], params["wv"]], axis=1).astype(compute_dtype)
    wo = params["wo"].astype(compute_dtype)
    wi = params["wi"].astype(compute_dtype)
    wo2 = params["wo2"].astype(compute_dtype)
    # TODO(synk): optional fp8 quantization of Wi/Wo2 for the v7x MXU path.
    bq = params["bq"].astype(f32)
    bkv = jnp.concatenate([params["bk"], params["bv"]], axis=1).astype(f32)
    bo = params["bo"].astype(f32)
    bi = params["bi"].astype(f32)
    bo2 = params["bo2"].astype(f32)
    g1, be1 = params["gamma1"].astype(f32), params["beta1"].astype(f32)
    g2, be2 = params["gamma2"].astype(f32), params["beta2"].astype(f32)

    kernel = functools.partial(_bert_layer_kernel, num_heads=num_heads,
                               head_dim=head_dim, hidden=H, tq=qt_sz,
                               head_group=head_group, eps=eps)

    scratch_shapes = [
        pltpu.VMEM((qt_sz, H), compute_dtype),   # Q (scaled) for this tile
        pltpu.VMEM((S, H), compute_dtype),       # K cache (per batch element)
        pltpu.VMEM((S, H), compute_dtype),       # V cache (per batch element)
        pltpu.VMEM((qt_sz, H), compute_dtype),   # context slab
    ]

    cost = pl.CostEstimate(
        flops=int(2 * B * S * (4 * H * H + 2 * H * I + 2 * S * H)),
        transcendentals=int(B * S * (num_heads * S + I)),
        bytes_accessed=int(wbytes * (4 * H * H + 2 * H * I)
                           + x.size * wbytes + x.size * out_bytes
                           + attention_mask.size * 4),
    )

    def _run(single_weights):
        rep2 = lambda b, qt: (0, 0)
        const_kw = {}
        if single_weights and hasattr(pl, "Buffered"):
            # Constant blocks never change -> single buffer (halves weight VMEM).
            const_kw = dict(pipeline_mode=pl.Buffered(1))
        const = lambda shape: pl.BlockSpec(shape, rep2, **const_kw)
        in_specs = [
            pl.BlockSpec((None, S, H), lambda b, qt: (b, 0, 0)),   # x (full seq)
            pl.BlockSpec((None, 1, S), lambda b, qt: (b, 0, 0)),   # additive mask
            const((H, H)), const((1, H)),            # Wq, bq
            const((H, 2 * H)), const((1, 2 * H)),    # Wk|Wv, bk|bv (fused)
            const((H, H)), const((1, H)),            # Wo, bo
            const((1, H)), const((1, H)),            # gamma1, beta1
            const((H, I)), const((1, I)),            # Wi, bi
            const((I, H)), const((1, H)),            # Wo2, bo2
            const((1, H)), const((1, H)),            # gamma2, beta2
        ]
        return pl.pallas_call(
            kernel,
            out_shape=jax.ShapeDtypeStruct((B, S, H), x.dtype),
            grid=(B, n_qt),
            in_specs=in_specs,
            out_specs=pl.BlockSpec((None, qt_sz, H), lambda b, qt: (b, qt, 0)),
            scratch_shapes=scratch_shapes,
            compiler_params=pltpu.CompilerParams(
                # batch is independent (megacore-shardable); the q-tile axis
                # carries the K/V scratch cache so it must stay "arbitrary".
                # TODO(synk): for B==1 on v7x (2 TCs) split q-tiles or heads
                # across cores (core_map) so the second core is not idle.
                dimension_semantics=("parallel", "arbitrary"),
                vmem_limit_bytes=vmem_cap,
            ),
            cost_estimate=cost,
        )(x_c, attention_mask,
          wq, bq, wkv, bkv, wo, bo, g1, be1,
          wi, bi, wo2, bo2, g2, be2)

    try:
        return _run(single_weights=True)
    except Exception:
        # Fallback: default double-buffered weights (larger VMEM footprint).
        return _run(single_weights=False)


# ---------------------------------------------------------------------------
# pure-JAX reference (matches the PyTorch BertLayer forward in eval mode)
# ---------------------------------------------------------------------------
def bert_layer_ref(x, attention_mask, params, *, num_heads, eps=1e-12):
    B, S, H = x.shape
    dh = H // num_heads
    x = x.astype(jnp.float32)
    if attention_mask is None:
        attention_mask = jnp.zeros((B, 1, S), jnp.float32)
    mask = attention_mask.astype(jnp.float32)

    q = x @ params["wq"] + params["bq"]
    k = x @ params["wk"] + params["bk"]
    v = x @ params["wv"] + params["bv"]

    def split(t):
        return t.reshape(B, S, num_heads, dh).transpose(0, 2, 1, 3)

    qh, kh, vh = split(q), split(k), split(v)
    scores = (qh @ kh.transpose(0, 1, 3, 2)) / math.sqrt(dh)
    scores = scores + mask[:, :, None, :]
    scores = scores - jnp.max(scores, axis=-1, keepdims=True)
    p = jnp.exp(scores)
    probs = p / jnp.sum(p, axis=-1, keepdims=True)
    ctx = (probs @ vh).transpose(0, 2, 1, 3).reshape(B, S, H)

    attn = ctx @ params["wo"] + params["bo"]
    y1 = _layer_norm(attn + x, params["gamma1"], params["beta1"], eps)
    inter = y1 @ params["wi"] + params["bi"]
    inter = 0.5 * inter * (1.0 + _erf_exact(inter / math.sqrt(2.0)))
    out = inter @ params["wo2"] + params["bo2"]
    return _layer_norm(out + y1, params["gamma2"], params["beta2"], eps)


# ---------------------------------------------------------------------------
# params
# ---------------------------------------------------------------------------
def init_params(key, hidden_size, intermediate_size):
    H, I = hidden_size, intermediate_size
    ks = jax.random.split(key, 12)
    std = 0.02

    def w(k, shape):
        # Round to bf16-representable values so the bf16 kernel and the f32
        # reference consume identical parameter values.
        v = jax.random.normal(k, shape, jnp.float32) * std
        return v.astype(jnp.bfloat16).astype(jnp.float32)

    return {
        "wq": w(ks[0], (H, H)), "bq": w(ks[1], (1, H)),
        "wk": w(ks[2], (H, H)), "bk": w(ks[3], (1, H)),
        "wv": w(ks[4], (H, H)), "bv": w(ks[5], (1, H)),
        "wo": w(ks[6], (H, H)), "bo": w(ks[7], (1, H)),
        "gamma1": jnp.ones((1, H), jnp.float32),
        "beta1": jnp.zeros((1, H), jnp.float32),
        "wi": w(ks[8], (H, I)), "bi": w(ks[9], (1, I)),
        "wo2": w(ks[10], (I, H)), "bo2": w(ks[11], (1, H)),
        "gamma2": jnp.ones((1, H), jnp.float32),
        "beta2": jnp.zeros((1, H), jnp.float32),
    }


if __name__ == "__main__":
    # batch, seq, hidden_size, num_attention_heads, intermediate_size
    B, S, H, NH = 2, 8, 32, 4
    I = 4 * H

    key = jax.random.PRNGKey(0)
    kx, kp = jax.random.split(key, 2)
    x = jax.random.normal(kx, (B, S, H), jnp.float32)
    # Round to bf16-representable so only in-kernel bf16 rounding differs
    # from the f32 reference.
    x = x.astype(jnp.bfloat16).astype(jnp.float32)
    params = init_params(kp, H, I)

    # BERT-style additive mask: 0 = attend, -10000 = masked.
    lengths = jnp.array([S, S - 2])
    key_pos = jnp.arange(S)[None, None, :]
    attention_mask = jnp.where(key_pos < lengths[:, None, None],
                               0.0, -10000.0).astype(jnp.float32)

    # TODO(synk): training-mode dropout (attention probs / hidden) and
    # head_mask are not implemented; the kernel matches eval-mode forward.
    out = bert_layer(x, attention_mask, params, num_heads=NH)
    out = jax.block_until_ready(out)

    ref = bert_layer_ref(x, attention_mask, params, num_heads=NH)
    np.testing.assert_allclose(np.asarray(out, dtype=np.float32),
                               np.asarray(ref), rtol=0, atol=3e-2)
    print("KERNEL_OK")
</pallas_src>

<mosaic_0001>
module attributes {stable_mosaic.version = 11 : i64} {
  func.func @_bert_layer_kernel(%arg0: i32, %arg1: i32, %arg2: memref<1x8x32xbf16, #tpu.memory_space<vmem>>, %arg3: memref<1x1x8xf32, #tpu.memory_space<vmem>>, %arg4: memref<32x32xbf16, #tpu.memory_space<vmem>>, %arg5: memref<1x32xf32, #tpu.memory_space<vmem>>, %arg6: memref<32x64xbf16, #tpu.memory_space<vmem>>, %arg7: memref<1x64xf32, #tpu.memory_space<vmem>>, %arg8: memref<32x32xbf16, #tpu.memory_space<vmem>>, %arg9: memref<1x32xf32, #tpu.memory_space<vmem>>, %arg10: memref<1x32xf32, #tpu.memory_space<vmem>>, %arg11: memref<1x32xf32, #tpu.memory_space<vmem>>, %arg12: memref<32x128xbf16, #tpu.memory_space<vmem>>, %arg13: memref<1x128xf32, #tpu.memory_space<vmem>>, %arg14: memref<128x32xbf16, #tpu.memory_space<vmem>>, %arg15: memref<1x32xf32, #tpu.memory_space<vmem>>, %arg16: memref<1x32xf32, #tpu.memory_space<vmem>>, %arg17: memref<1x32xf32, #tpu.memory_space<vmem>>, %arg18: memref<1x8x32xf32, #tpu.memory_space<vmem>>, %arg19: memref<8x32xbf16, #tpu.memory_space<vmem>>, %arg20: memref<8x32xbf16, #tpu.memory_space<vmem>>, %arg21: memref<8x32xbf16, #tpu.memory_space<vmem>>, %arg22: memref<8x32xbf16, #tpu.memory_space<vmem>>) attributes {dimension_semantics = [#tpu.dimension_semantics<parallel>, #tpu.dimension_semantics<arbitrary>], iteration_bounds = array<i64: 2, 1>, scalar_prefetch = 0 : i64, scratch_operands = 4 : i64, tpu.core_type = #tpu.core_type<tc>, window_params = [{transform_indices = @transform_0, window_bounds = array<i64: 1, 8, 32>}, {transform_indices = @transform_1, window_bounds = array<i64: 1, 1, 8>}, {pipeline_mode = #tpu.pipeline_mode<synchronous>, transform_indices = @transform_2, window_bounds = array<i64: 32, 32>}, {pipeline_mode = #tpu.pipeline_mode<synchronous>, transform_indices = @transform_3, window_bounds = array<i64: 1, 32>}, {pipeline_mode = #tpu.pipeline_mode<synchronous>, transform_indices = @transform_4, window_bounds = array<i64: 32, 64>}, {pipeline_mode = #tpu.pipeline_mode<synchronous>, transform_indices = @transform_5, window_bounds = array<i64: 1, 64>}, {pipeline_mode = #tpu.pipeline_mode<synchronous>, transform_indices = @transform_6, window_bounds = array<i64: 32, 32>}, {pipeline_mode = #tpu.pipeline_mode<synchronous>, transform_indices = @transform_7, window_bounds = array<i64: 1, 32>}, {pipeline_mode = #tpu.pipeline_mode<synchronous>, transform_indices = @transform_8, window_bounds = array<i64: 1, 32>}, {pipeline_mode = #tpu.pipeline_mode<synchronous>, transform_indices = @transform_9, window_bounds = array<i64: 1, 32>}, {pipeline_mode = #tpu.pipeline_mode<synchronous>, transform_indices = @transform_10, window_bounds = array<i64: 32, 128>}, {pipeline_mode = #tpu.pipeline_mode<synchronous>, transform_indices = @transform_11, window_bounds = array<i64: 1, 128>}, {pipeline_mode = #tpu.pipeline_mode<synchronous>, transform_indices = @transform_12, window_bounds = array<i64: 128, 32>}, {pipeline_mode = #tpu.pipeline_mode<synchronous>, transform_indices = @transform_13, window_bounds = array<i64: 1, 32>}, {pipeline_mode = #tpu.pipeline_mode<synchronous>, transform_indices = @transform_14, window_bounds = array<i64: 1, 32>}, {pipeline_mode = #tpu.pipeline_mode<synchronous>, transform_indices = @transform_15, window_bounds = array<i64: 1, 32>}, {transform_indices = @transform_16, window_bounds = array<i64: 1, 8, 32>}]} {
    %c0_i32 = arith.constant 0 : i32
    %0 = arith.cmpi eq, %arg1, %c0_i32 : i32
    %1 = arith.extui %0 : i1 to i32
    %c0_i32_0 = arith.constant 0 : i32
    %2 = arith.cmpi ne, %1, %c0_i32_0 : i32
    scf.if %2 {
      %c0_103 = arith.constant 0 : index
      %c0_104 = arith.constant 0 : index
      %c0_105 = arith.constant 0 : index
      %203 = vector.load %arg2[%c0_103, %c0_104, %c0_105] : memref<1x8x32xbf16, #tpu.memory_space<vmem>>, vector<1x8x32xbf16>
      %204 = vector.shape_cast %203 : vector<1x8x32xbf16> to vector<8x32xbf16>
      %c0_106 = arith.constant 0 : index
      %c0_107 = arith.constant 0 : index
      %205 = vector.load %arg6[%c0_106, %c0_107] : memref<32x64xbf16, #tpu.memory_space<vmem>>, vector<32x64xbf16>
      %cst_108 = arith.constant dense<0.000000e+00> : vector<8x64xf32>
      %206 = tpu.matmul %204, %205, %cst_108 {dimension_numbers = #tpu.dot_dimension_numbers<[1], [0], [0], [1], [0, 0, 1, 1], [], []>} : vector<8x32xbf16>, vector<32x64xbf16>, vector<8x64xf32> -> vector<8x64xf32>
      %c0_109 = arith.constant 0 : index
      %c0_110 = arith.constant 0 : index
      %207 = vector.load %arg7[%c0_109, %c0_110] : memref<1x64xf32, #tpu.memory_space<vmem>>, vector<1x64xf32>
      %208 = vector.broadcast %207 : vector<1x64xf32> to vector<8x64xf32>
      %209 = arith.addf %206, %208 : vector<8x64xf32>
      %210 = vector.extract_strided_slice %209 {offsets = [0, 0], sizes = [8, 32], strides = [1, 1]} : vector<8x64xf32> to vector<8x32xf32>
      %211 = arith.truncf %210 : vector<8x32xf32> to vector<8x32xbf16>
      %c0_111 = arith.constant 0 : index
      %c0_112 = arith.constant 0 : index
      %212 = vector.load %arg20[%c0_111, %c0_112] : memref<8x32xbf16, #tpu.memory_space<vmem>>, vector<8x32xbf16>
      tpu.vector_store %arg20[%c0_111, %c0_112], %211 {strides = array<i32>} : memref<8x32xbf16, #tpu.memory_space<vmem>>, vector<8x32xbf16>,
      %213 = vector.extract_strided_slice %209 {offsets = [0, 32], sizes = [8, 32], strides = [1, 1]} : vector<8x64xf32> to vector<8x32xf32>
      %214 = arith.truncf %213 : vector<8x32xf32> to vector<8x32xbf16>
      %c0_113 = arith.constant 0 : index
      %c0_114 = arith.constant 0 : index
      %215 = vector.load %arg21[%c0_113, %c0_114] : memref<8x32xbf16, #tpu.memory_space<vmem>>, vector<8x32xbf16>
      tpu.vector_store %arg21[%c0_113, %c0_114], %214 {strides = array<i32>} : memref<8x32xbf16, #tpu.memory_space<vmem>>, vector<8x32xbf16>,
    } else {
    }
    %c8_i32 = arith.constant 8 : i32
    %3 = arith.muli %arg1, %c8_i32 : i32
    %4 = tpu.assume_multiple %3, 8 : i32
    %c0 = arith.constant 0 : index
    %5 = arith.index_cast %4 : i32 to index
    %c0_1 = arith.constant 0 : index
    %6 = vector.load %arg2[%c0, %5, %c0_1] : memref<1x8x32xbf16, #tpu.memory_space<vmem>>, vector<1x8x32xbf16>
    %7 = vector.shape_cast %6 : vector<1x8x32xbf16> to vector<8x32xbf16>
    %c0_2 = arith.constant 0 : index
    %c0_3 = arith.constant 0 : index
    %8 = vector.load %arg4[%c0_2, %c0_3] : memref<32x32xbf16, #tpu.memory_space<vmem>>, vector<32x32xbf16>
    %cst = arith.constant dense<0.000000e+00> : vector<8x32xf32>
    %9 = tpu.matmul %7, %8, %cst {dimension_numbers = #tpu.dot_dimension_numbers<[1], [0], [0], [1], [0, 0, 1, 1], [], []>} : vector<8x32xbf16>, vector<32x32xbf16>, vector<8x32xf32> -> vector<8x32xf32>
    %c0_4 = arith.constant 0 : index
    %c0_5 = arith.constant 0 : index
    %10 = vector.load %arg5[%c0_4, %c0_5] : memref<1x32xf32, #tpu.memory_space<vmem>>, vector<1x32xf32>
    %11 = vector.broadcast %10 : vector<1x32xf32> to vector<8x32xf32>
    %12 = arith.addf %9, %11 : vector<8x32xf32>
    %cst_6 = arith.constant 0.353553385 : f32
    %13 = vector.broadcast %cst_6 : f32 to vector<8x32xf32>
    %14 = arith.mulf %12, %13 : vector<8x32xf32>
    %15 = arith.truncf %14 : vector<8x32xf32> to vector<8x32xbf16>
    %c0_7 = arith.constant 0 : index
    %c0_8 = arith.constant 0 : index
    %16 = vector.load %arg19[%c0_7, %c0_8] : memref<8x32xbf16, #tpu.memory_space<vmem>>, vector<8x32xbf16>
    tpu.vector_store %arg19[%c0_7, %c0_8], %15 {strides = array<i32>} : memref<8x32xbf16, #tpu.memory_space<vmem>>, vector<8x32xbf16>,
    %c0_9 = arith.constant 0 : index
    %c0_10 = arith.constant 0 : index
    %c0_11 = arith.constant 0 : index
    %17 = vector.load %arg3[%c0_9, %c0_10, %c0_11] : memref<1x1x8xf32, #tpu.memory_space<vmem>>, vector<1x1x8xf32>
    %18 = vector.shape_cast %17 : vector<1x1x8xf32> to vector<1x8xf32>
    %19 = vector.shape_cast %18 : vector<1x8xf32> to vector<1x8xf32>
    %20 = vector.broadcast %19 : vector<1x8xf32> to vector<8x8xf32>
    %c0_12 = arith.constant 0 : index
    %c0_13 = arith.constant 0 : index
    %21 = vector.load %arg19[%c0_12, %c0_13] : memref<8x32xbf16, #tpu.memory_space<vmem>>, vector<8x8xbf16>
    %c0_14 = arith.constant 0 : index
    %c0_15 = arith.constant 0 : index
    %22 = vector.load %arg20[%c0_14, %c0_15] : memref<8x32xbf16, #tpu.memory_space<vmem>>, vector<8x8xbf16>
    %c0_16 = arith.constant 0 : index
    %c0_17 = arith.constant 0 : index
    %23 = vector.load %arg21[%c0_16, %c0_17] : memref<8x32xbf16, #tpu.memory_space<vmem>>, vector<8x8xbf16>
    %cst_18 = arith.constant dense<0.000000e+00> : vector<8x8xf32>
    %24 = tpu.matmul %21, %22, %cst_18 {dimension_numbers = #tpu.dot_dimension_numbers<[1], [1], [0], [0], [0, 0, 1, 0], [], []>} : vector<8x8xbf16>, vector<8x8xbf16>, vector<8x8xf32> -> vector<8x8xf32>
    %25 = arith.addf %24, %20 : vector<8x8xf32>
    %cst_19 = arith.constant dense<0xFF800000> : vector<8xf32>
    %26 = vector.multi_reduction <maximumf>, %25, %cst_19 [1] : vector<8x8xf32> to vector<8xf32>
    %27 = vector.shape_cast %26 : vector<8xf32> to vector<8x1xf32>
    %28 = vector.broadcast %27 : vector<8x1xf32> to vector<8x8xf32>
    %29 = arith.subf %25, %28 : vector<8x8xf32>
    %30 = math.exp %29 : vector<8x8xf32>
    %cst_20 = arith.constant dense<0.000000e+00> : vector<8xf32>
    %31 = vector.multi_reduction <add>, %30, %cst_20 [1] : vector<8x8xf32> to vector<8xf32>
    %32 = vector.shape_cast %31 : vector<8xf32> to vector<8x1xf32>
    %33 = tpu.reciprocal %32 {approx = true} : vector<8x1xf32> -> vector<8x1xf32>
    %34 = arith.truncf %30 : vector<8x8xf32> to vector<8x8xbf16>
    %cst_21 = arith.constant dense<0.000000e+00> : vector<8x8xf32>
    %35 = tpu.matmul %34, %23, %cst_21 {dimension_numbers = #tpu.dot_dimension_numbers<[1], [0], [0], [1], [0, 0, 1, 1], [], []>} : vector<8x8xbf16>, vector<8x8xbf16>, vector<8x8xf32> -> vector<8x8xf32>
    %36 = vector.broadcast %33 : vector<8x1xf32> to vector<8x8xf32>
    %37 = arith.mulf %35, %36 : vector<8x8xf32>
    %c0_22 = arith.constant 0 : index
    %c8 = arith.constant 8 : index
    %38 = vector.load %arg19[%c0_22, %c8] : memref<8x32xbf16, #tpu.memory_space<vmem>>, vector<8x8xbf16>
    %c0_23 = arith.constant 0 : index
    %c8_24 = arith.constant 8 : index
    %39 = vector.load %arg20[%c0_23, %c8_24] : memref<8x32xbf16, #tpu.memory_space<vmem>>, vector<8x8xbf16>
    %c0_25 = arith.constant 0 : index
    %c8_26 = arith.constant 8 : index
    %40 = vector.load %arg21[%c0_25, %c8_26] : memref<8x32xbf16, #tpu.memory_space<vmem>>, vector<8x8xbf16>
    %cst_27 = arith.constant dense<0.000000e+00> : vector<8x8xf32>
    %41 = tpu.matmul %38, %39, %cst_27 {dimension_numbers = #tpu.dot_dimension_numbers<[1], [1], [0], [0], [0, 0, 1, 0], [], []>} : vector<8x8xbf16>, vector<8x8xbf16>, vector<8x8xf32> -> vector<8x8xf32>
    %42 = arith.addf %41, %20 : vector<8x8xf32>
    %cst_28 = arith.constant dense<0xFF800000> : vector<8xf32>
    %43 = vector.multi_reduction <maximumf>, %42, %cst_28 [1] : vector<8x8xf32> to vector<8xf32>
    %44 = vector.shape_cast %43 : vector<8xf32> to vector<8x1xf32>
    %45 = vector.broadcast %44 : vector<8x1xf32> to vector<8x8xf32>
    %46 = arith.subf %42, %45 : vector<8x8xf32>
    %47 = math.exp %46 : vector<8x8xf32>
    %cst_29 = arith.constant dense<0.000000e+00> : vector<8xf32>
    %48 = vector.multi_reduction <add>, %47, %cst_29 [1] : vector<8x8xf32> to vector<8xf32>
    %49 = vector.shape_cast %48 : vector<8xf32> to vector<8x1xf32>
    %50 = tpu.reciprocal %49 {approx = true} : vector<8x1xf32> -> vector<8x1xf32>
    %51 = arith.truncf %47 : vector<8x8xf32> to vector<8x8xbf16>
    %cst_30 = arith.constant dense<0.000000e+00> : vector<8x8xf32>
    %52 = tpu.matmul %51, %40, %cst_30 {dimension_numbers = #tpu.dot_dimension_numbers<[1], [0], [0], [1], [0, 0, 1, 1], [], []>} : vector<8x8xbf16>, vector<8x8xbf16>, vector<8x8xf32> -> vector<8x8xf32>
    %53 = vector.broadcast %50 : vector<8x1xf32> to vector<8x8xf32>
    %54 = arith.mulf %52, %53 : vector<8x8xf32>
    %c0_31 = arith.constant 0 : index
    %c16 = arith.constant 16 : index
    %55 = vector.load %arg19[%c0_31, %c16] : memref<8x32xbf16, #tpu.memory_space<vmem>>, vector<8x8xbf16>
    %c0_32 = arith.constant 0 : index
    %c16_33 = arith.constant 16 : index
    %56 = vector.load %arg20[%c0_32, %c16_33] : memref<8x32xbf16, #tpu.memory_space<vmem>>, vector<8x8xbf16>
    %c0_34 = arith.constant 0 : index
    %c16_35 = arith.constant 16 : index
    %57 = vector.load %arg21[%c0_34, %c16_35] : memref<8x32xbf16, #tpu.memory_space<vmem>>, vector<8x8xbf16>
    %cst_36 = arith.constant dense<0.000000e+00> : vector<8x8xf32>
    %58 = tpu.matmul %55, %56, %cst_36 {dimension_numbers = #tpu.dot_dimension_numbers<[1], [1], [0], [0], [0, 0, 1, 0], [], []>} : vector<8x8xbf16>, vector<8x8xbf16>, vector<8x8xf32> -> vector<8x8xf32>
    %59 = arith.addf %58, %20 : vector<8x8xf32>
    %cst_37 = arith.constant dense<0xFF800000> : vector<8xf32>
    %60 = vector.multi_reduction <maximumf>, %59, %cst_37 [1] : vector<8x8xf32> to vector<8xf32>
    %61 = vector.shape_cast %60 : vector<8xf32> to vector<8x1xf32>
    %62 = vector.broadcast %61 : vector<8x1xf32> to vector<8x8xf32>
    %63 = arith.subf %59, %62 : vector<8x8xf32>
    %64 = math.exp %63 : vector<8x8xf32>
    %cst_38 = arith.constant dense<0.000000e+00> : vector<8xf32>
    %65 = vector.multi_reduction <add>, %64, %cst_38 [1] : vector<8x8xf32> to vector<8xf32>
    %66 = vector.shape_cast %65 : vector<8xf32> to vector<8x1xf32>
    %67 = tpu.reciprocal %66 {approx = true} : vector<8x1xf32> -> vector<8x1xf32>
    %68 = arith.truncf %64 : vector<8x8xf32> to vector<8x8xbf16>
    %cst_39 = arith.constant dense<0.000000e+00> : vector<8x8xf32>
    %69 = tpu.matmul %68, %57, %cst_39 {dimension_numbers = #tpu.dot_dimension_numbers<[1], [0], [0], [1], [0, 0, 1, 1], [], []>} : vector<8x8xbf16>, vector<8x8xbf16>, vector<8x8xf32> -> vector<8x8xf32>
    %70 = vector.broadcast %67 : vector<8x1xf32> to vector<8x8xf32>
    %71 = arith.mulf %69, %70 : vector<8x8xf32>
    %c0_40 = arith.constant 0 : index
    %c24 = arith.constant 24 : index
    %72 = vector.load %arg19[%c0_40, %c24] : memref<8x32xbf16, #tpu.memory_space<vmem>>, vector<8x8xbf16>
    %c0_41 = arith.constant 0 : index
    %c24_42 = arith.constant 24 : index
    %73 = vector.load %arg20[%c0_41, %c24_42] : memref<8x32xbf16, #tpu.memory_space<vmem>>, vector<8x8xbf16>
    %c0_43 = arith.constant 0 : index
    %c24_44 = arith.constant 24 : index
    %74 = vector.load %arg21[%c0_43, %c24_44] : memref<8x32xbf16, #tpu.memory_space<vmem>>, vector<8x8xbf16>
    %cst_45 = arith.constant dense<0.000000e+00> : vector<8x8xf32>
    %75 = tpu.matmul %72, %73, %cst_45 {dimension_numbers = #tpu.dot_dimension_numbers<[1], [1], [0], [0], [0, 0, 1, 0], [], []>} : vector<8x8xbf16>, vector<8x8xbf16>, vector<8x8xf32> -> vector<8x8xf32>
    %76 = arith.addf %75, %20 : vector<8x8xf32>
    %cst_46 = arith.constant dense<0xFF800000> : vector<8xf32>
    %77 = vector.multi_reduction <maximumf>, %76, %cst_46 [1] : vector<8x8xf32> to vector<8xf32>
    %78 = vector.shape_cast %77 : vector<8xf32> to vector<8x1xf32>
    %79 = vector.broadcast %78 : vector<8x1xf32> to vector<8x8xf32>
    %80 = arith.subf %76, %79 : vector<8x8xf32>
    %81 = math.exp %80 : vector<8x8xf32>
    %cst_47 = arith.constant dense<0.000000e+00> : vector<8xf32>
    %82 = vector.multi_reduction <add>, %81, %cst_47 [1] : vector<8x8xf32> to vector<8xf32>
    %83 = vector.shape_cast %82 : vector<8xf32> to vector<8x1xf32>
    %84 = tpu.reciprocal %83 {approx = true} : vector<8x1xf32> -> vector<8x1xf32>
    %85 = arith.truncf %81 : vector<8x8xf32> to vector<8x8xbf16>
    %cst_48 = arith.constant dense<0.000000e+00> : vector<8x8xf32>
    %86 = tpu.matmul %85, %74, %cst_48 {dimension_numbers = #tpu.dot_dimension_numbers<[1], [0], [0], [1], [0, 0, 1, 1], [], []>} : vector<8x8xbf16>, vector<8x8xbf16>, vector<8x8xf32> -> vector<8x8xf32>
    %87 = vector.broadcast %84 : vector<8x1xf32> to vector<8x8xf32>
    %88 = arith.mulf %86, %87 : vector<8x8xf32>
    %89 = tpu.concatenate %37, %54, %71, %88 in 1 : vector<8x8xf32>, vector<8x8xf32>, vector<8x8xf32>, vector<8x8xf32> -> vector<8x32xf32>
    %90 = arith.truncf %89 : vector<8x32xf32> to vector<8x32xbf16>
    %c0_49 = arith.constant 0 : index
    %c0_50 = arith.constant 0 : index
    %91 = vector.load %arg22[%c0_49, %c0_50] : memref<8x32xbf16, #tpu.memory_space<vmem>>, vector<8x32xbf16>
    tpu.vector_store %arg22[%c0_49, %c0_50], %90 {strides = array<i32>} : memref<8x32xbf16, #tpu.memory_space<vmem>>, vector<8x32xbf16>,
    %c0_51 = arith.constant 0 : index
    %c0_52 = arith.constant 0 : index
    %92 = vector.load %arg22[%c0_51, %c0_52] : memref<8x32xbf16, #tpu.memory_space<vmem>>, vector<8x32xbf16>
    %c0_53 = arith.constant 0 : index
    %c0_54 = arith.constant 0 : index
    %93 = vector.load %arg8[%c0_53, %c0_54] : memref<32x32xbf16, #tpu.memory_space<vmem>>, vector<32x32xbf16>
    %cst_55 = arith.constant dense<0.000000e+00> : vector<8x32xf32>
    %94 = tpu.matmul %92, %93, %cst_55 {dimension_numbers = #tpu.dot_dimension_numbers<[1], [0], [0], [1], [0, 0, 1, 1], [], []>} : vector<8x32xbf16>, vector<32x32xbf16>, vector<8x32xf32> -> vector<8x32xf32>
    %c0_56 = arith.constant 0 : index
    %c0_57 = arith.constant 0 : index
    %95 = vector.load %arg9[%c0_56, %c0_57] : memref<1x32xf32, #tpu.memory_space<vmem>>, vector<1x32xf32>
    %96 = vector.broadcast %95 : vector<1x32xf32> to vector<8x32xf32>
    %97 = arith.addf %94, %96 : vector<8x32xf32>
    %98 = arith.extf %7 : vector<8x32xbf16> to vector<8x32xf32>
    %99 = arith.addf %97, %98 : vector<8x32xf32>
    %c0_58 = arith.constant 0 : index
    %c0_59 = arith.constant 0 : index
    %100 = vector.load %arg10[%c0_58, %c0_59] : memref<1x32xf32, #tpu.memory_space<vmem>>, vector<1x32xf32>
    %c0_60 = arith.constant 0 : index
    %c0_61 = arith.constant 0 : index
    %101 = vector.load %arg11[%c0_60, %c0_61] : memref<1x32xf32, #tpu.memory_space<vmem>>, vector<1x32xf32>
    %cst_62 = arith.constant dense<0.000000e+00> : vector<8xf32>
    %102 = vector.multi_reduction <add>, %99, %cst_62 [1] : vector<8x32xf32> to vector<8xf32>
    %103 = vector.shape_cast %102 : vector<8xf32> to vector<8x1xf32>
    %cst_63 = arith.constant 3.200000e+01 : f32
    %104 = vector.broadcast %cst_63 : f32 to vector<8x1xf32>
    %105 = arith.divf %103, %104 : vector<8x1xf32>
    %106 = vector.broadcast %105 : vector<8x1xf32> to vector<8x32xf32>
    %107 = arith.subf %99, %106 : vector<8x32xf32>
    %108 = arith.mulf %107, %107 : vector<8x32xf32>
    %cst_64 = arith.constant dense<0.000000e+00> : vector<8xf32>
    %109 = vector.multi_reduction <add>, %108, %cst_64 [1] : vector<8x32xf32> to vector<8xf32>
    %110 = vector.shape_cast %109 : vector<8xf32> to vector<8x1xf32>
    %cst_65 = arith.constant 3.200000e+01 : f32
    %111 = vector.broadcast %cst_65 : f32 to vector<8x1xf32>
    %112 = arith.divf %110, %111 : vector<8x1xf32>
    %113 = vector.broadcast %105 : vector<8x1xf32> to vector<8x32xf32>
    %114 = arith.subf %99, %113 : vector<8x32xf32>
    %cst_66 = arith.constant 9.99999996E-13 : f32
    %115 = vector.broadcast %cst_66 : f32 to vector<8x1xf32>
    %116 = arith.addf %112, %115 : vector<8x1xf32>
    %117 = math.rsqrt %116 : vector<8x1xf32>
    %118 = vector.broadcast %117 : vector<8x1xf32> to vector<8x32xf32>
    %119 = arith.mulf %114, %118 : vector<8x32xf32>
    %120 = vector.broadcast %100 : vector<1x32xf32> to vector<8x32xf32>
    %121 = arith.mulf %119, %120 : vector<8x32xf32>
    %122 = vector.broadcast %101 : vector<1x32xf32> to vector<8x32xf32>
    %123 = arith.addf %121, %122 : vector<8x32xf32>
    %124 = arith.truncf %123 : vector<8x32xf32> to vector<8x32xbf16>
    %c0_67 = arith.constant 0 : index
    %c0_68 = arith.constant 0 : index
    %125 = vector.load %arg12[%c0_67, %c0_68] : memref<32x128xbf16, #tpu.memory_space<vmem>>, vector<32x128xbf16>
    %cst_69 = arith.constant dense<0.000000e+00> : vector<8x128xf32>
    %126 = tpu.matmul %124, %125, %cst_69 {dimension_numbers = #tpu.dot_dimension_numbers<[1], [0], [0], [1], [0, 0, 1, 1], [], []>} : vector<8x32xbf16>, vector<32x128xbf16>, vector<8x128xf32> -> vector<8x128xf32>
    %c0_70 = arith.constant 0 : index
    %c0_71 = arith.constant 0 : index
    %127 = vector.load %arg13[%c0_70, %c0_71] : memref<1x128xf32, #tpu.memory_space<vmem>>, vector<1x128xf32>
    %128 = vector.broadcast %127 : vector<1x128xf32> to vector<8x128xf32>
    %129 = arith.addf %126, %128 : vector<8x128xf32>
    %cst_72 = arith.constant 5.000000e-01 : f32
    %130 = vector.broadcast %cst_72 : f32 to vector<8x128xf32>
    %131 = arith.mulf %130, %129 : vector<8x128xf32>
    %cst_73 = arith.constant 0.707106769 : f32
    %132 = vector.broadcast %cst_73 : f32 to vector<8x128xf32>
    %133 = arith.mulf %129, %132 : vector<8x128xf32>
    %134 = math.absf %133 : vector<8x128xf32>
    %cst_74 = arith.constant 0.327591091 : f32
    %135 = vector.broadcast %cst_74 : f32 to vector<8x128xf32>
    %136 = arith.mulf %135, %134 : vector<8x128xf32>
    %cst_75 = arith.constant 1.000000e+00 : f32
    %137 = vector.broadcast %cst_75 : f32 to vector<8x128xf32>
    %138 = arith.addf %137, %136 : vector<8x128xf32>
    %139 = tpu.reciprocal %138 {approx = true} : vector<8x128xf32> -> vector<8x128xf32>
    %cst_76 = arith.constant 1.06140542 : f32
    %140 = vector.broadcast %cst_76 : f32 to vector<8x128xf32>
    %141 = arith.mulf %139, %140 : vector<8x128xf32>
    %cst_77 = arith.constant -1.45315206 : f32
    %142 = vector.broadcast %cst_77 : f32 to vector<8x128xf32>
    %143 = arith.addf %142, %141 : vector<8x128xf32>
    %144 = arith.mulf %139, %143 : vector<8x128xf32>
    %cst_78 = arith.constant 1.42141378 : f32
    %145 = vector.broadcast %cst_78 : f32 to vector<8x128xf32>
    %146 = arith.addf %145, %144 : vector<8x128xf32>
    %147 = arith.mulf %139, %146 : vector<8x128xf32>
    %cst_79 = arith.constant -0.284496725 : f32
    %148 = vector.broadcast %cst_79 : f32 to vector<8x128xf32>
    %149 = arith.addf %148, %147 : vector<8x128xf32>
    %150 = arith.mulf %139, %149 : vector<8x128xf32>
    %cst_80 = arith.constant 0.254829586 : f32
    %151 = vector.broadcast %cst_80 : f32 to vector<8x128xf32>
    %152 = arith.addf %151, %150 : vector<8x128xf32>
    %153 = arith.mulf %139, %152 : vector<8x128xf32>
    %cst_81 = arith.constant 0.000000e+00 : f32
    %154 = vector.broadcast %cst_81 : f32 to vector<8x128xf32>
    %155 = arith.subf %154, %134 : vector<8x128xf32>
    %156 = arith.mulf %155, %134 : vector<8x128xf32>
    %157 = math.exp %156 : vector<8x128xf32>
    %158 = arith.mulf %153, %157 : vector<8x128xf32>
    %cst_82 = arith.constant 1.000000e+00 : f32
    %159 = vector.broadcast %cst_82 : f32 to vector<8x128xf32>
    %160 = arith.subf %159, %158 : vector<8x128xf32>
    %cst_83 = arith.constant 0.000000e+00 : f32
    %161 = vector.broadcast %cst_83 : f32 to vector<8x128xf32>
    %162 = arith.cmpf oge, %133, %161 : vector<8x128xf32>
    %cst_84 = arith.constant 0.000000e+00 : f32
    %163 = vector.broadcast %cst_84 : f32 to vector<8x128xf32>
    %164 = arith.subf %163, %160 : vector<8x128xf32>
    %165 = arith.select %162, %160, %164 : vector<8x128xi1>, vector<8x128xf32>
    %cst_85 = arith.constant 1.000000e+00 : f32
    %166 = vector.broadcast %cst_85 : f32 to vector<8x128xf32>
    %167 = arith.addf %166, %165 : vector<8x128xf32>
    %168 = arith.mulf %131, %167 : vector<8x128xf32>
    %169 = arith.truncf %168 : vector<8x128xf32> to vector<8x128xbf16>
    %c0_86 = arith.constant 0 : index
    %c0_87 = arith.constant 0 : index
    %170 = vector.load %arg14[%c0_86, %c0_87] : memref<128x32xbf16, #tpu.memory_space<vmem>>, vector<128x32xbf16>
    %cst_88 = arith.constant dense<0.000000e+00> : vector<8x32xf32>
    %171 = tpu.matmul %169, %170, %cst_88 {dimension_numbers = #tpu.dot_dimension_numbers<[1], [0], [0], [1], [0, 0, 1, 1], [], []>} : vector<8x128xbf16>, vector<128x32xbf16>, vector<8x32xf32> -> vector<8x32xf32>
    %c0_89 = arith.constant 0 : index
    %c0_90 = arith.constant 0 : index
    %172 = vector.load %arg15[%c0_89, %c0_90] : memref<1x32xf32, #tpu.memory_space<vmem>>, vector<1x32xf32>
    %173 = vector.broadcast %172 : vector<1x32xf32> to vector<8x32xf32>
    %174 = arith.addf %171, %173 : vector<8x32xf32>
    %175 = arith.addf %174, %123 : vector<8x32xf32>
    %c0_91 = arith.constant 0 : index
    %c0_92 = arith.constant 0 : index
    %176 = vector.load %arg16[%c0_91, %c0_92] : memref<1x32xf32, #tpu.memory_space<vmem>>, vector<1x32xf32>
    %c0_93 = arith.constant 0 : index
    %c0_94 = arith.constant 0 : index
    %177 = vector.load %arg17[%c0_93, %c0_94] : memref<1x32xf32, #tpu.memory_space<vmem>>, vector<1x32xf32>
    %cst_95 = arith.constant dense<0.000000e+00> : vector<8xf32>
    %178 = vector.multi_reduction <add>, %175, %cst_95 [1] : vector<8x32xf32> to vector<8xf32>
    %179 = vector.shape_cast %178 : vector<8xf32> to vector<8x1xf32>
    %cst_96 = arith.constant 3.200000e+01 : f32
    %180 = vector.broadcast %cst_96 : f32 to vector<8x1xf32>
    %181 = arith.divf %179, %180 : vector<8x1xf32>
    %182 = vector.broadcast %181 : vector<8x1xf32> to vector<8x32xf32>
    %183 = arith.subf %175, %182 : vector<8x32xf32>
    %184 = arith.mulf %183, %183 : vector<8x32xf32>
    %cst_97 = arith.constant dense<0.000000e+00> : vector<8xf32>
    %185 = vector.multi_reduction <add>, %184, %cst_97 [1] : vector<8x32xf32> to vector<8xf32>
    %186 = vector.shape_cast %185 : vector<8xf32> to vector<8x1xf32>
    %cst_98 = arith.constant 3.200000e+01 : f32
    %187 = vector.broadcast %cst_98 : f32 to vector<8x1xf32>
    %188 = arith.divf %186, %187 : vector<8x1xf32>
    %189 = vector.broadcast %181 : vector<8x1xf32> to vector<8x32xf32>
    %190 = arith.subf %175, %189 : vector<8x32xf32>
    %cst_99 = arith.constant 9.99999996E-13 : f32
    %191 = vector.broadcast %cst_99 : f32 to vector<8x1xf32>
    %192 = arith.addf %188, %191 : vector<8x1xf32>
    %193 = math.rsqrt %192 : vector<8x1xf32>
    %194 = vector.broadcast %193 : vector<8x1xf32> to vector<8x32xf32>
    %195 = arith.mulf %190, %194 : vector<8x32xf32>
    %196 = vector.broadcast %176 : vector<1x32xf32> to vector<8x32xf32>
    %197 = arith.mulf %195, %196 : vector<8x32xf32>
    %198 = vector.broadcast %177 : vector<1x32xf32> to vector<8x32xf32>
    %199 = arith.addf %197, %198 : vector<8x32xf32>
    %c0_100 = arith.constant 0 : index
    %c0_101 = arith.constant 0 : index
    %c0_102 = arith.constant 0 : index
    %200 = vector.load %arg18[%c0_100, %c0_101, %c0_102] : memref<1x8x32xf32, #tpu.memory_space<vmem>>, vector<1x8x32xf32>
    %201 = vector.shape_cast %200 : vector<1x8x32xf32> to vector<8x32xf32>
    %202 = vector.shape_cast %199 : vector<8x32xf32> to vector<1x8x32xf32>
    tpu.vector_store %arg18[%c0_100, %c0_101, %c0_102], %202 {strides = array<i32>} : memref<1x8x32xf32, #tpu.memory_space<vmem>>, vector<1x8x32xf32>,
    return
  }
  func.func @transform_0(%arg0: i32, %arg1: i32) -> (i32, i32, i32) {
    %c0_i32 = arith.constant 0 : i32
    %c0_i32_0 = arith.constant 0 : i32
    %c0_i32_1 = arith.constant 0 : i32
    return %arg0, %c0_i32, %c0_i32_0 : i32, i32, i32
  }
  func.func @transform_1(%arg0: i32, %arg1: i32) -> (i32, i32, i32) {
    %c0_i32 = arith.constant 0 : i32
    %c0_i32_0 = arith.constant 0 : i32
    %c0_i32_1 = arith.constant 0 : i32
    return %arg0, %c0_i32, %c0_i32_0 : i32, i32, i32
  }
  func.func @transform_2(%arg0: i32, %arg1: i32) -> (i32, i32) {
    %c0_i32 = arith.constant 0 : i32
    %c0_i32_0 = arith.constant 0 : i32
    %c0_i32_1 = arith.constant 0 : i32
    return %c0_i32, %c0_i32_0 : i32, i32
  }
  func.func @transform_3(%arg0: i32, %arg1: i32) -> (i32, i32) {
    %c0_i32 = arith.constant 0 : i32
    %c0_i32_0 = arith.constant 0 : i32
    %c0_i32_1 = arith.constant 0 : i32
    return %c0_i32, %c0_i32_0 : i32, i32
  }
  func.func @transform_4(%arg0: i32, %arg1: i32) -> (i32, i32) {
    %c0_i32 = arith.constant 0 : i32
    %c0_i32_0 = arith.constant 0 : i32
    %c0_i32_1 = arith.constant 0 : i32
    return %c0_i32, %c0_i32_0 : i32, i32
  }
  func.func @transform_5(%arg0: i32, %arg1: i32) -> (i32, i32) {
    %c0_i32 = arith.constant 0 : i32
    %c0_i32_0 = arith.constant 0 : i32
    %c0_i32_1 = arith.constant 0 : i32
    return %c0_i32, %c0_i32_0 : i32, i32
  }
  func.func @transform_6(%arg0: i32, %arg1: i32) -> (i32, i32) {
    %c0_i32 = arith.constant 0 : i32
    %c0_i32_0 = arith.constant 0 : i32
    %c0_i32_1 = arith.constant 0 : i32
    return %c0_i32, %c0_i32_0 : i32, i32
  }
  func.func @transform_7(%arg0: i32, %arg1: i32) -> (i32, i32) {
    %c0_i32 = arith.constant 0 : i32
    %c0_i32_0 = arith.constant 0 : i32
    %c0_i32_1 = arith.constant 0 : i32
    return %c0_i32, %c0_i32_0 : i32, i32
  }
  func.func @transform_8(%arg0: i32, %arg1: i32) -> (i32, i32) {
    %c0_i32 = arith.constant 0 : i32
    %c0_i32_0 = arith.constant 0 : i32
    %c0_i32_1 = arith.constant 0 : i32
    return %c0_i32, %c0_i32_0 : i32, i32
  }
  func.func @transform_9(%arg0: i32, %arg1: i32) -> (i32, i32) {
    %c0_i32 = arith.constant 0 : i32
    %c0_i32_0 = arith.constant 0 : i32
    %c0_i32_1 = arith.constant 0 : i32
    return %c0_i32, %c0_i32_0 : i32, i32
  }
  func.func @transform_10(%arg0: i32, %arg1: i32) -> (i32, i32) {
    %c0_i32 = arith.constant 0 : i32
    %c0_i32_0 = arith.constant 0 : i32
    %c0_i32_1 = arith.constant 0 : i32
    return %c0_i32, %c0_i32_0 : i32, i32
  }
  func.func @transform_11(%arg0: i32, %arg1: i32) -> (i32, i32) {
    %c0_i32 = arith.constant 0 : i32
    %c0_i32_0 = arith.constant 0 : i32
    %c0_i32_1 = arith.constant 0 : i32
    return %c0_i32, %c0_i32_0 : i32, i32
  }
  func.func @transform_12(%arg0: i32, %arg1: i32) -> (i32, i32) {
    %c0_i32 = arith.constant 0 : i32
    %c0_i32_0 = arith.constant 0 : i32
    %c0_i32_1 = arith.constant 0 : i32
    return %c0_i32, %c0_i32_0 : i32, i32
  }
  func.func @transform_13(%arg0: i32, %arg1: i32) -> (i32, i32) {
    %c0_i32 = arith.constant 0 : i32
    %c0_i32_0 = arith.constant 0 : i32
    %c0_i32_1 = arith.constant 0 : i32
    return %c0_i32, %c0_i32_0 : i32, i32
  }
  func.func @transform_14(%arg0: i32, %arg1: i32) -> (i32, i32) {
    %c0_i32 = arith.constant 0 : i32
    %c0_i32_0 = arith.constant 0 : i32
    %c0_i32_1 = arith.constant 0 : i32
    return %c0_i32, %c0_i32_0 : i32, i32
  }
  func.func @transform_15(%arg0: i32, %arg1: i32) -> (i32, i32) {
    %c0_i32 = arith.constant 0 : i32
    %c0_i32_0 = arith.constant 0 : i32
    %c0_i32_1 = arith.constant 0 : i32
    return %c0_i32, %c0_i32_0 : i32, i32
  }
  func.func @transform_16(%arg0: i32, %arg1: i32) -> (i32, i32, i32) {
    %c0_i32 = arith.constant 0 : i32
    %c0_i32_0 = arith.constant 0 : i32
    return %arg0, %arg1, %c0_i32 : i32, i32, i32
  }
}

module attributes {stable_mosaic.version = 11 : i64} {
  func.func @_bert_layer_kernel(%arg0: i32, %arg1: i32, %arg2: memref<1x8x32xbf16, #tpu.memory_space<vmem>>, %arg3: memref<1x1x8xf32, #tpu.memory_space<vmem>>, %arg4: memref<32x32xbf16, #tpu.memory_space<vmem>>, %arg5: memref<1x32xf32, #tpu.memory_space<vmem>>, %arg6: memref<32x64xbf16, #tpu.memory_space<vmem>>, %arg7: memref<1x64xf32, #tpu.memory_space<vmem>>, %arg8: memref<32x32xbf16, #tpu.memory_space<vmem>>, %arg9: memref<1x32xf32, #tpu.memory_space<vmem>>, %arg10: memref<1x32xf32, #tpu.memory_space<vmem>>, %arg11: memref<1x32xf32, #tpu.memory_space<vmem>>, %arg12: memref<32x128xbf16, #tpu.memory_space<vmem>>, %arg13: memref<1x128xf32, #tpu.memory_space<vmem>>, %arg14: memref<128x32xbf16, #tpu.memory_space<vmem>>, %arg15: memref<1x32xf32, #tpu.memory_space<vmem>>, %arg16: memref<1x32xf32, #tpu.memory_space<vmem>>, %arg17: memref<1x32xf32, #tpu.memory_space<vmem>>, %arg18: memref<1x8x32xf32, #tpu.memory_space<vmem>>, %arg19: memref<8x32xbf16, #tpu.memory_space<vmem>>, %arg20: memref<8x32xbf16, #tpu.memory_space<vmem>>, %arg21: memref<8x32xbf16, #tpu.memory_space<vmem>>, %arg22: memref<8x32xbf16, #tpu.memory_space<vmem>>) attributes {dimension_semantics = [#tpu.dimension_semantics<parallel>, #tpu.dimension_semantics<arbitrary>], iteration_bounds = array<i64: 2, 1>, scalar_prefetch = 0 : i64, scratch_operands = 4 : i64, tpu.core_type = #tpu.core_type<tc>, window_params = [{transform_indices = @transform_0, window_bounds = array<i64: 1, 8, 32>}, {transform_indices = @transform_1, window_bounds = array<i64: 1, 1, 8>}, {pipeline_mode = #tpu.pipeline_mode<synchronous>, transform_indices = @transform_2, window_bounds = array<i64: 32, 32>}, {pipeline_mode = #tpu.pipeline_mode<synchronous>, transform_indices = @transform_3, window_bounds = array<i64: 1, 32>}, {pipeline_mode = #tpu.pipeline_mode<synchronous>, transform_indices = @transform_4, window_bounds = array<i64: 32, 64>}, {pipeline_mode = #tpu.pipeline_mode<synchronous>, transform_indices = @transform_5, window_bounds = array<i64: 1, 64>}, {pipeline_mode = #tpu.pipeline_mode<synchronous>, transform_indices = @transform_6, window_bounds = array<i64: 32, 32>}, {pipeline_mode = #tpu.pipeline_mode<synchronous>, transform_indices = @transform_7, window_bounds = array<i64: 1, 32>}, {pipeline_mode = #tpu.pipeline_mode<synchronous>, transform_indices = @transform_8, window_bounds = array<i64: 1, 32>}, {pipeline_mode = #tpu.pipeline_mode<synchronous>, transform_indices = @transform_9, window_bounds = array<i64: 1, 32>}, {pipeline_mode = #tpu.pipeline_mode<synchronous>, transform_indices = @transform_10, window_bounds = array<i64: 32, 128>}, {pipeline_mode = #tpu.pipeline_mode<synchronous>, transform_indices = @transform_11, window_bounds = array<i64: 1, 128>}, {pipeline_mode = #tpu.pipeline_mode<synchronous>, transform_indices = @transform_12, window_bounds = array<i64: 128, 32>}, {pipeline_mode = #tpu.pipeline_mode<synchronous>, transform_indices = @transform_13, window_bounds = array<i64: 1, 32>}, {pipeline_mode = #tpu.pipeline_mode<synchronous>, transform_indices = @transform_14, window_bounds = array<i64: 1, 32>}, {pipeline_mode = #tpu.pipeline_mode<synchronous>, transform_indices = @transform_15, window_bounds = array<i64: 1, 32>}, {transform_indices = @transform_16, window_bounds = array<i64: 1, 8, 32>}]} {
    %c0_i32 = arith.constant 0 : i32
    %0 = arith.cmpi eq, %arg1, %c0_i32 : i32
    %1 = arith.extui %0 : i1 to i32
    %c0_i32_0 = arith.constant 0 : i32
    %2 = arith.cmpi ne, %1, %c0_i32_0 : i32
    scf.if %2 {
      %c0_103 = arith.constant 0 : index
      %c0_104 = arith.constant 0 : index
      %c0_105 = arith.constant 0 : index
      %203 = vector.load %arg2[%c0_103, %c0_104, %c0_105] : memref<1x8x32xbf16, #tpu.memory_space<vmem>>, vector<1x8x32xbf16>
      %204 = vector.shape_cast %203 : vector<1x8x32xbf16> to vector<8x32xbf16>
      %c0_106 = arith.constant 0 : index
      %c0_107 = arith.constant 0 : index
      %205 = vector.load %arg6[%c0_106, %c0_107] : memref<32x64xbf16, #tpu.memory_space<vmem>>, vector<32x64xbf16>
      %cst_108 = arith.constant dense<0.000000e+00> : vector<8x64xf32>
      %206 = tpu.matmul %204, %205, %cst_108 {dimension_numbers = #tpu.dot_dimension_numbers<[1], [0], [0], [1], [0, 0, 1, 1], [], []>} : vector<8x32xbf16>, vector<32x64xbf16>, vector<8x64xf32> -> vector<8x64xf32>
      %c0_109 = arith.constant 0 : index
      %c0_110 = arith.constant 0 : index
      %207 = vector.load %arg7[%c0_109, %c0_110] : memref<1x64xf32, #tpu.memory_space<vmem>>, vector<1x64xf32>
      %208 = vector.broadcast %207 : vector<1x64xf32> to vector<8x64xf32>
      %209 = arith.addf %206, %208 : vector<8x64xf32>
      %210 = vector.extract_strided_slice %209 {offsets = [0, 0], sizes = [8, 32], strides = [1, 1]} : vector<8x64xf32> to vector<8x32xf32>
      %211 = arith.truncf %210 : vector<8x32xf32> to vector<8x32xbf16>
      %c0_111 = arith.constant 0 : index
      %c0_112 = arith.constant 0 : index
      %212 = vector.load %arg20[%c0_111, %c0_112] : memref<8x32xbf16, #tpu.memory_space<vmem>>, vector<8x32xbf16>
      tpu.vector_store %arg20[%c0_111, %c0_112], %211 {strides = array<i32>} : memref<8x32xbf16, #tpu.memory_space<vmem>>, vector<8x32xbf16>,
      %213 = vector.extract_strided_slice %209 {offsets = [0, 32], sizes = [8, 32], strides = [1, 1]} : vector<8x64xf32> to vector<8x32xf32>
      %214 = arith.truncf %213 : vector<8x32xf32> to vector<8x32xbf16>
      %c0_113 = arith.constant 0 : index
      %c0_114 = arith.constant 0 : index
      %215 = vector.load %arg21[%c0_113, %c0_114] : memref<8x32xbf16, #tpu.memory_space<vmem>>, vector<8x32xbf16>
      tpu.vector_store %arg21[%c0_113, %c0_114], %214 {strides = array<i32>} : memref<8x32xbf16, #tpu.memory_space<vmem>>, vector<8x32xbf16>,
    } else {
    }
    %c8_i32 = arith.constant 8 : i32
    %3 = arith.muli %arg1, %c8_i32 : i32
    %4 = tpu.assume_multiple %3, 8 : i32
    %c0 = arith.constant 0 : index
    %5 = arith.index_cast %4 : i32 to index
    %c0_1 = arith.constant 0 : index
    %6 = vector.load %arg2[%c0, %5, %c0_1] : memref<1x8x32xbf16, #tpu.memory_space<vmem>>, vector<1x8x32xbf16>
    %7 = vector.shape_cast %6 : vector<1x8x32xbf16> to vector<8x32xbf16>
    %c0_2 = arith.constant 0 : index
    %c0_3 = arith.constant 0 : index
    %8 = vector.load %arg4[%c0_2, %c0_3] : memref<32x32xbf16, #tpu.memory_space<vmem>>, vector<32x32xbf16>
    %cst = arith.constant dense<0.000000e+00> : vector<8x32xf32>
    %9 = tpu.matmul %7, %8, %cst {dimension_numbers = #tpu.dot_dimension_numbers<[1], [0], [0], [1], [0, 0, 1, 1], [], []>} : vector<8x32xbf16>, vector<32x32xbf16>, vector<8x32xf32> -> vector<8x32xf32>
    %c0_4 = arith.constant 0 : index
    %c0_5 = arith.constant 0 : index
    %10 = vector.load %arg5[%c0_4, %c0_5] : memref<1x32xf32, #tpu.memory_space<vmem>>, vector<1x32xf32>
    %11 = vector.broadcast %10 : vector<1x32xf32> to vector<8x32xf32>
    %12 = arith.addf %9, %11 : vector<8x32xf32>
    %cst_6 = arith.constant 0.353553385 : f32
    %13 = vector.broadcast %cst_6 : f32 to vector<8x32xf32>
    %14 = arith.mulf %12, %13 : vector<8x32xf32>
    %15 = arith.truncf %14 : vector<8x32xf32> to vector<8x32xbf16>
    %c0_7 = arith.constant 0 : index
    %c0_8 = arith.constant 0 : index
    %16 = vector.load %arg19[%c0_7, %c0_8] : memref<8x32xbf16, #tpu.memory_space<vmem>>, vector<8x32xbf16>
    tpu.vector_store %arg19[%c0_7, %c0_8], %15 {strides = array<i32>} : memref<8x32xbf16, #tpu.memory_space<vmem>>, vector<8x32xbf16>,
    %c0_9 = arith.constant 0 : index
    %c0_10 = arith.constant 0 : index
    %c0_11 = arith.constant 0 : index
    %17 = vector.load %arg3[%c0_9, %c0_10, %c0_11] : memref<1x1x8xf32, #tpu.memory_space<vmem>>, vector<1x1x8xf32>
    %18 = vector.shape_cast %17 : vector<1x1x8xf32> to vector<1x8xf32>
    %19 = vector.shape_cast %18 : vector<1x8xf32> to vector<1x8xf32>
    %20 = vector.broadcast %19 : vector<1x8xf32> to vector<8x8xf32>
    %c0_12 = arith.constant 0 : index
    %c0_13 = arith.constant 0 : index
    %21 = vector.load %arg19[%c0_12, %c0_13] : memref<8x32xbf16, #tpu.memory_space<vmem>>, vector<8x8xbf16>
    %c0_14 = arith.constant 0 : index
    %c0_15 = arith.constant 0 : index
    %22 = vector.load %arg20[%c0_14, %c0_15] : memref<8x32xbf16, #tpu.memory_space<vmem>>, vector<8x8xbf16>
    %c0_16 = arith.constant 0 : index
    %c0_17 = arith.constant 0 : index
    %23 = vector.load %arg21[%c0_16, %c0_17] : memref<8x32xbf16, #tpu.memory_space<vmem>>, vector<8x8xbf16>
    %cst_18 = arith.constant dense<0.000000e+00> : vector<8x8xf32>
    %24 = tpu.matmul %21, %22, %cst_18 {dimension_numbers = #tpu.dot_dimension_numbers<[1], [1], [0], [0], [0, 0, 1, 0], [], []>} : vector<8x8xbf16>, vector<8x8xbf16>, vector<8x8xf32> -> vector<8x8xf32>
    %25 = arith.addf %24, %20 : vector<8x8xf32>
    %cst_19 = arith.constant dense<0xFF800000> : vector<8xf32>
    %26 = vector.multi_reduction <maximumf>, %25, %cst_19 [1] : vector<8x8xf32> to vector<8xf32>
    %27 = vector.shape_cast %26 : vector<8xf32> to vector<8x1xf32>
    %28 = vector.broadcast %27 : vector<8x1xf32> to vector<8x8xf32>
    %29 = arith.subf %25, %28 : vector<8x8xf32>
    %30 = math.exp %29 : vector<8x8xf32>
    %cst_20 = arith.constant dense<0.000000e+00> : vector<8xf32>
    %31 = vector.multi_reduction <add>, %30, %cst_20 [1] : vector<8x8xf32> to vector<8xf32>
    %32 = vector.shape_cast %31 : vector<8xf32> to vector<8x1xf32>
    %33 = tpu.reciprocal %32 {approx = true} : vector<8x1xf32> -> vector<8x1xf32>
    %34 = arith.truncf %30 : vector<8x8xf32> to vector<8x8xbf16>
    %cst_21 = arith.constant dense<0.000000e+00> : vector<8x8xf32>
    %35 = tpu.matmul %34, %23, %cst_21 {dimension_numbers = #tpu.dot_dimension_numbers<[1], [0], [0], [1], [0, 0, 1, 1], [], []>} : vector<8x8xbf16>, vector<8x8xbf16>, vector<8x8xf32> -> vector<8x8xf32>
    %36 = vector.broadcast %33 : vector<8x1xf32> to vector<8x8xf32>
    %37 = arith.mulf %35, %36 : vector<8x8xf32>
    %c0_22 = arith.constant 0 : index
    %c8 = arith.constant 8 : index
    %38 = vector.load %arg19[%c0_22, %c8] : memref<8x32xbf16, #tpu.memory_space<vmem>>, vector<8x8xbf16>
    %c0_23 = arith.constant 0 : index
    %c8_24 = arith.constant 8 : index
    %39 = vector.load %arg20[%c0_23, %c8_24] : memref<8x32xbf16, #tpu.memory_space<vmem>>, vector<8x8xbf16>
    %c0_25 = arith.constant 0 : index
    %c8_26 = arith.constant 8 : index
    %40 = vector.load %arg21[%c0_25, %c8_26] : memref<8x32xbf16, #tpu.memory_space<vmem>>, vector<8x8xbf16>
    %cst_27 = arith.constant dense<0.000000e+00> : vector<8x8xf32>
    %41 = tpu.matmul %38, %39, %cst_27 {dimension_numbers = #tpu.dot_dimension_numbers<[1], [1], [0], [0], [0, 0, 1, 0], [], []>} : vector<8x8xbf16>, vector<8x8xbf16>, vector<8x8xf32> -> vector<8x8xf32>
    %42 = arith.addf %41, %20 : vector<8x8xf32>
    %cst_28 = arith.constant dense<0xFF800000> : vector<8xf32>
    %43 = vector.multi_reduction <maximumf>, %42, %cst_28 [1] : vector<8x8xf32> to vector<8xf32>
    %44 = vector.shape_cast %43 : vector<8xf32> to vector<8x1xf32>
    %45 = vector.broadcast %44 : vector<8x1xf32> to vector<8x8xf32>
    %46 = arith.subf %42, %45 : vector<8x8xf32>
    %47 = math.exp %46 : vector<8x8xf32>
    %cst_29 = arith.constant dense<0.000000e+00> : vector<8xf32>
    %48 = vector.multi_reduction <add>, %47, %cst_29 [1] : vector<8x8xf32> to vector<8xf32>
    %49 = vector.shape_cast %48 : vector<8xf32> to vector<8x1xf32>
    %50 = tpu.reciprocal %49 {approx = true} : vector<8x1xf32> -> vector<8x1xf32>
    %51 = arith.truncf %47 : vector<8x8xf32> to vector<8x8xbf16>
    %cst_30 = arith.constant dense<0.000000e+00> : vector<8x8xf32>
    %52 = tpu.matmul %51, %40, %cst_30 {dimension_numbers = #tpu.dot_dimension_numbers<[1], [0], [0], [1], [0, 0, 1, 1], [], []>} : vector<8x8xbf16>, vector<8x8xbf16>, vector<8x8xf32> -> vector<8x8xf32>
    %53 = vector.broadcast %50 : vector<8x1xf32> to vector<8x8xf32>
    %54 = arith.mulf %52, %53 : vector<8x8xf32>
    %c0_31 = arith.constant 0 : index
    %c16 = arith.constant 16 : index
    %55 = vector.load %arg19[%c0_31, %c16] : memref<8x32xbf16, #tpu.memory_space<vmem>>, vector<8x8xbf16>
    %c0_32 = arith.constant 0 : index
    %c16_33 = arith.constant 16 : index
    %56 = vector.load %arg20[%c0_32, %c16_33] : memref<8x32xbf16, #tpu.memory_space<vmem>>, vector<8x8xbf16>
    %c0_34 = arith.constant 0 : index
    %c16_35 = arith.constant 16 : index
    %57 = vector.load %arg21[%c0_34, %c16_35] : memref<8x32xbf16, #tpu.memory_space<vmem>>, vector<8x8xbf16>
    %cst_36 = arith.constant dense<0.000000e+00> : vector<8x8xf32>
    %58 = tpu.matmul %55, %56, %cst_36 {dimension_numbers = #tpu.dot_dimension_numbers<[1], [1], [0], [0], [0, 0, 1, 0], [], []>} : vector<8x8xbf16>, vector<8x8xbf16>, vector<8x8xf32> -> vector<8x8xf32>
    %59 = arith.addf %58, %20 : vector<8x8xf32>
    %cst_37 = arith.constant dense<0xFF800000> : vector<8xf32>
    %60 = vector.multi_reduction <maximumf>, %59, %cst_37 [1] : vector<8x8xf32> to vector<8xf32>
    %61 = vector.shape_cast %60 : vector<8xf32> to vector<8x1xf32>
    %62 = vector.broadcast %61 : vector<8x1xf32> to vector<8x8xf32>
    %63 = arith.subf %59, %62 : vector<8x8xf32>
    %64 = math.exp %63 : vector<8x8xf32>
    %cst_38 = arith.constant dense<0.000000e+00> : vector<8xf32>
    %65 = vector.multi_reduction <add>, %64, %cst_38 [1] : vector<8x8xf32> to vector<8xf32>
    %66 = vector.shape_cast %65 : vector<8xf32> to vector<8x1xf32>
    %67 = tpu.reciprocal %66 {approx = true} : vector<8x1xf32> -> vector<8x1xf32>
    %68 = arith.truncf %64 : vector<8x8xf32> to vector<8x8xbf16>
    %cst_39 = arith.constant dense<0.000000e+00> : vector<8x8xf32>
    %69 = tpu.matmul %68, %57, %cst_39 {dimension_numbers = #tpu.dot_dimension_numbers<[1], [0], [0], [1], [0, 0, 1, 1], [], []>} : vector<8x8xbf16>, vector<8x8xbf16>, vector<8x8xf32> -> vector<8x8xf32>
    %70 = vector.broadcast %67 : vector<8x1xf32> to vector<8x8xf32>
    %71 = arith.mulf %69, %70 : vector<8x8xf32>
    %c0_40 = arith.constant 0 : index
    %c24 = arith.constant 24 : index
    %72 = vector.load %arg19[%c0_40, %c24] : memref<8x32xbf16, #tpu.memory_space<vmem>>, vector<8x8xbf16>
    %c0_41 = arith.constant 0 : index
    %c24_42 = arith.constant 24 : index
    %73 = vector.load %arg20[%c0_41, %c24_42] : memref<8x32xbf16, #tpu.memory_space<vmem>>, vector<8x8xbf16>
    %c0_43 = arith.constant 0 : index
    %c24_44 = arith.constant 24 : index
    %74 = vector.load %arg21[%c0_43, %c24_44] : memref<8x32xbf16, #tpu.memory_space<vmem>>, vector<8x8xbf16>
    %cst_45 = arith.constant dense<0.000000e+00> : vector<8x8xf32>
    %75 = tpu.matmul %72, %73, %cst_45 {dimension_numbers = #tpu.dot_dimension_numbers<[1], [1], [0], [0], [0, 0, 1, 0], [], []>} : vector<8x8xbf16>, vector<8x8xbf16>, vector<8x8xf32> -> vector<8x8xf32>
    %76 = arith.addf %75, %20 : vector<8x8xf32>
    %cst_46 = arith.constant dense<0xFF800000> : vector<8xf32>
    %77 = vector.multi_reduction <maximumf>, %76, %cst_46 [1] : vector<8x8xf32> to vector<8xf32>
    %78 = vector.shape_cast %77 : vector<8xf32> to vector<8x1xf32>
    %79 = vector.broadcast %78 : vector<8x1xf32> to vector<8x8xf32>
    %80 = arith.subf %76, %79 : vector<8x8xf32>
    %81 = math.exp %80 : vector<8x8xf32>
    %cst_47 = arith.constant dense<0.000000e+00> : vector<8xf32>
    %82 = vector.multi_reduction <add>, %81, %cst_47 [1] : vector<8x8xf32> to vector<8xf32>
    %83 = vector.shape_cast %82 : vector<8xf32> to vector<8x1xf32>
    %84 = tpu.reciprocal %83 {approx = true} : vector<8x1xf32> -> vector<8x1xf32>
    %85 = arith.truncf %81 : vector<8x8xf32> to vector<8x8xbf16>
    %cst_48 = arith.constant dense<0.000000e+00> : vector<8x8xf32>
    %86 = tpu.matmul %85, %74, %cst_48 {dimension_numbers = #tpu.dot_dimension_numbers<[1], [0], [0], [1], [0, 0, 1, 1], [], []>} : vector<8x8xbf16>, vector<8x8xbf16>, vector<8x8xf32> -> vector<8x8xf32>
    %87 = vector.broadcast %84 : vector<8x1xf32> to vector<8x8xf32>
    %88 = arith.mulf %86, %87 : vector<8x8xf32>
    %89 = tpu.concatenate %37, %54, %71, %88 in 1 : vector<8x8xf32>, vector<8x8xf32>, vector<8x8xf32>, vector<8x8xf32> -> vector<8x32xf32>
    %90 = arith.truncf %89 : vector<8x32xf32> to vector<8x32xbf16>
    %c0_49 = arith.constant 0 : index
    %c0_50 = arith.constant 0 : index
    %91 = vector.load %arg22[%c0_49, %c0_50] : memref<8x32xbf16, #tpu.memory_space<vmem>>, vector<8x32xbf16>
    tpu.vector_store %arg22[%c0_49, %c0_50], %90 {strides = array<i32>} : memref<8x32xbf16, #tpu.memory_space<vmem>>, vector<8x32xbf16>,
    %c0_51 = arith.constant 0 : index
    %c0_52 = arith.constant 0 : index
    %92 = vector.load %arg22[%c0_51, %c0_52] : memref<8x32xbf16, #tpu.memory_space<vmem>>, vector<8x32xbf16>
    %c0_53 = arith.constant 0 : index
    %c0_54 = arith.constant 0 : index
    %93 = vector.load %arg8[%c0_53, %c0_54] : memref<32x32xbf16, #tpu.memory_space<vmem>>, vector<32x32xbf16>
    %cst_55 = arith.constant dense<0.000000e+00> : vector<8x32xf32>
    %94 = tpu.matmul %92, %93, %cst_55 {dimension_numbers = #tpu.dot_dimension_numbers<[1], [0], [0], [1], [0, 0, 1, 1], [], []>} : vector<8x32xbf16>, vector<32x32xbf16>, vector<8x32xf32> -> vector<8x32xf32>
    %c0_56 = arith.constant 0 : index
    %c0_57 = arith.constant 0 : index
    %95 = vector.load %arg9[%c0_56, %c0_57] : memref<1x32xf32, #tpu.memory_space<vmem>>, vector<1x32xf32>
    %96 = vector.broadcast %95 : vector<1x32xf32> to vector<8x32xf32>
    %97 = arith.addf %94, %96 : vector<8x32xf32>
    %98 = arith.extf %7 : vector<8x32xbf16> to vector<8x32xf32>
    %99 = arith.addf %97, %98 : vector<8x32xf32>
    %c0_58 = arith.constant 0 : index
    %c0_59 = arith.constant 0 : index
    %100 = vector.load %arg10[%c0_58, %c0_59] : memref<1x32xf32, #tpu.memory_space<vmem>>, vector<1x32xf32>
    %c0_60 = arith.constant 0 : index
    %c0_61 = arith.constant 0 : index
    %101 = vector.load %arg11[%c0_60, %c0_61] : memref<1x32xf32, #tpu.memory_space<vmem>>, vector<1x32xf32>
    %cst_62 = arith.constant dense<0.000000e+00> : vector<8xf32>
    %102 = vector.multi_reduction <add>, %99, %cst_62 [1] : vector<8x32xf32> to vector<8xf32>
    %103 = vector.shape_cast %102 : vector<8xf32> to vector<8x1xf32>
    %cst_63 = arith.constant 3.200000e+01 : f32
    %104 = vector.broadcast %cst_63 : f32 to vector<8x1xf32>
    %105 = arith.divf %103, %104 : vector<8x1xf32>
    %106 = vector.broadcast %105 : vector<8x1xf32> to vector<8x32xf32>
    %107 = arith.subf %99, %106 : vector<8x32xf32>
    %108 = arith.mulf %107, %107 : vector<8x32xf32>
    %cst_64 = arith.constant dense<0.000000e+00> : vector<8xf32>
    %109 = vector.multi_reduction <add>, %108, %cst_64 [1] : vector<8x32xf32> to vector<8xf32>
    %110 = vector.shape_cast %109 : vector<8xf32> to vector<8x1xf32>
    %cst_65 = arith.constant 3.200000e+01 : f32
    %111 = vector.broadcast %cst_65 : f32 to vector<8x1xf32>
    %112 = arith.divf %110, %111 : vector<8x1xf32>
    %113 = vector.broadcast %105 : vector<8x1xf32> to vector<8x32xf32>
    %114 = arith.subf %99, %113 : vector<8x32xf32>
    %cst_66 = arith.constant 9.99999996E-13 : f32
    %115 = vector.broadcast %cst_66 : f32 to vector<8x1xf32>
    %116 = arith.addf %112, %115 : vector<8x1xf32>
    %117 = math.rsqrt %116 : vector<8x1xf32>
    %118 = vector.broadcast %117 : vector<8x1xf32> to vector<8x32xf32>
    %119 = arith.mulf %114, %118 : vector<8x32xf32>
    %120 = vector.broadcast %100 : vector<1x32xf32> to vector<8x32xf32>
    %121 = arith.mulf %119, %120 : vector<8x32xf32>
    %122 = vector.broadcast %101 : vector<1x32xf32> to vector<8x32xf32>
    %123 = arith.addf %121, %122 : vector<8x32xf32>
    %124 = arith.truncf %123 : vector<8x32xf32> to vector<8x32xbf16>
    %c0_67 = arith.constant 0 : index
    %c0_68 = arith.constant 0 : index
    %125 = vector.load %arg12[%c0_67, %c0_68] : memref<32x128xbf16, #tpu.memory_space<vmem>>, vector<32x128xbf16>
    %cst_69 = arith.constant dense<0.000000e+00> : vector<8x128xf32>
    %126 = tpu.matmul %124, %125, %cst_69 {dimension_numbers = #tpu.dot_dimension_numbers<[1], [0], [0], [1], [0, 0, 1, 1], [], []>} : vector<8x32xbf16>, vector<32x128xbf16>, vector<8x128xf32> -> vector<8x128xf32>
    %c0_70 = arith.constant 0 : index
    %c0_71 = arith.constant 0 : index
    %127 = vector.load %arg13[%c0_70, %c0_71] : memref<1x128xf32, #tpu.memory_space<vmem>>, vector<1x128xf32>
    %128 = vector.broadcast %127 : vector<1x128xf32> to vector<8x128xf32>
    %129 = arith.addf %126, %128 : vector<8x128xf32>
    %cst_72 = arith.constant 5.000000e-01 : f32
    %130 = vector.broadcast %cst_72 : f32 to vector<8x128xf32>
    %131 = arith.mulf %130, %129 : vector<8x128xf32>
    %cst_73 = arith.constant 0.707106769 : f32
    %132 = vector.broadcast %cst_73 : f32 to vector<8x128xf32>
    %133 = arith.mulf %129, %132 : vector<8x128xf32>
    %134 = math.absf %133 : vector<8x128xf32>
    %cst_74 = arith.constant 0.327591091 : f32
    %135 = vector.broadcast %cst_74 : f32 to vector<8x128xf32>
    %136 = arith.mulf %135, %134 : vector<8x128xf32>
    %cst_75 = arith.constant 1.000000e+00 : f32
    %137 = vector.broadcast %cst_75 : f32 to vector<8x128xf32>
    %138 = arith.addf %137, %136 : vector<8x128xf32>
    %139 = tpu.reciprocal %138 {approx = true} : vector<8x128xf32> -> vector<8x128xf32>
    %cst_76 = arith.constant 1.06140542 : f32
    %140 = vector.broadcast %cst_76 : f32 to vector<8x128xf32>
    %141 = arith.mulf %139, %140 : vector<8x128xf32>
    %cst_77 = arith.constant -1.45315206 : f32
    %142 = vector.broadcast %cst_77 : f32 to vector<8x128xf32>
    %143 = arith.addf %142, %141 : vector<8x128xf32>
    %144 = arith.mulf %139, %143 : vector<8x128xf32>
    %cst_78 = arith.constant 1.42141378 : f32
    %145 = vector.broadcast %cst_78 : f32 to vector<8x128xf32>
    %146 = arith.addf %145, %144 : vector<8x128xf32>
    %147 = arith.mulf %139, %146 : vector<8x128xf32>
    %cst_79 = arith.constant -0.284496725 : f32
    %148 = vector.broadcast %cst_79 : f32 to vector<8x128xf32>
    %149 = arith.addf %148, %147 : vector<8x128xf32>
    %150 = arith.mulf %139, %149 : vector<8x128xf32>
    %cst_80 = arith.constant 0.254829586 : f32
    %151 = vector.broadcast %cst_80 : f32 to vector<8x128xf32>
    %152 = arith.addf %151, %150 : vector<8x128xf32>
    %153 = arith.mulf %139, %152 : vector<8x128xf32>
    %cst_81 = arith.constant 0.000000e+00 : f32
    %154 = vector.broadcast %cst_81 : f32 to vector<8x128xf32>
    %155 = arith.subf %154, %134 : vector<8x128xf32>
    %156 = arith.mulf %155, %134 : vector<8x128xf32>
    %157 = math.exp %156 : vector<8x128xf32>
    %158 = arith.mulf %153, %157 : vector<8x128xf32>
    %cst_82 = arith.constant 1.000000e+00 : f32
    %159 = vector.broadcast %cst_82 : f32 to vector<8x128xf32>
    %160 = arith.subf %159, %158 : vector<8x128xf32>
    %cst_83 = arith.constant 0.000000e+00 : f32
    %161 = vector.broadcast %cst_83 : f32 to vector<8x128xf32>
    %162 = arith.cmpf oge, %133, %161 : vector<8x128xf32>
    %cst_84 = arith.constant 0.000000e+00 : f32
    %163 = vector.broadcast %cst_84 : f32 to vector<8x128xf32>
    %164 = arith.subf %163, %160 : vector<8x128xf32>
    %165 = arith.select %162, %160, %164 : vector<8x128xi1>, vector<8x128xf32>
    %cst_85 = arith.constant 1.000000e+00 : f32
    %166 = vector.broadcast %cst_85 : f32 to vector<8x128xf32>
    %167 = arith.addf %166, %165 : vector<8x128xf32>
    %168 = arith.mulf %131, %167 : vector<8x128xf32>
    %169 = arith.truncf %168 : vector<8x128xf32> to vector<8x128xbf16>
    %c0_86 = arith.constant 0 : index
    %c0_87 = arith.constant 0 : index
    %170 = vector.load %arg14[%c0_86, %c0_87] : memref<128x32xbf16, #tpu.memory_space<vmem>>, vector<128x32xbf16>
    %cst_88 = arith.constant dense<0.000000e+00> : vector<8x32xf32>
    %171 = tpu.matmul %169, %170, %cst_88 {dimension_numbers = #tpu.dot_dimension_numbers<[1], [0], [0], [1], [0, 0, 1, 1], [], []>} : vector<8x128xbf16>, vector<128x32xbf16>, vector<8x32xf32> -> vector<8x32xf32>
    %c0_89 = arith.constant 0 : index
    %c0_90 = arith.constant 0 : index
    %172 = vector.load %arg15[%c0_89, %c0_90] : memref<1x32xf32, #tpu.memory_space<vmem>>, vector<1x32xf32>
    %173 = vector.broadcast %172 : vector<1x32xf32> to vector<8x32xf32>
    %174 = arith.addf %171, %173 : vector<8x32xf32>
    %175 = arith.addf %174, %123 : vector<8x32xf32>
    %c0_91 = arith.constant 0 : index
    %c0_92 = arith.constant 0 : index
    %176 = vector.load %arg16[%c0_91, %c0_92] : memref<1x32xf32, #tpu.memory_space<vmem>>, vector<1x32xf32>
    %c0_93 = arith.constant 0 : index
    %c0_94 = arith.constant 0 : index
    %177 = vector.load %arg17[%c0_93, %c0_94] : memref<1x32xf32, #tpu.memory_space<vmem>>, vector<1x32xf32>
    %cst_95 = arith.constant dense<0.000000e+00> : vector<8xf32>
    %178 = vector.multi_reduction <add>, %175, %cst_95 [1] : vector<8x32xf32> to vector<8xf32>
    %179 = vector.shape_cast %178 : vector<8xf32> to vector<8x1xf32>
    %cst_96 = arith.constant 3.200000e+01 : f32
    %180 = vector.broadcast %cst_96 : f32 to vector<8x1xf32>
    %181 = arith.divf %179, %180 : vector<8x1xf32>
    %182 = vector.broadcast %181 : vector<8x1xf32> to vector<8x32xf32>
    %183 = arith.subf %175, %182 : vector<8x32xf32>
    %184 = arith.mulf %183, %183 : vector<8x32xf32>
    %cst_97 = arith.constant dense<0.000000e+00> : vector<8xf32>
    %185 = vector.multi_reduction <add>, %184, %cst_97 [1] : vector<8x32xf32> to vector<8xf32>
    %186 = vector.shape_cast %185 : vector<8xf32> to vector<8x1xf32>
    %cst_98 = arith.constant 3.200000e+01 : f32
    %187 = vector.broadcast %cst_98 : f32 to vector<8x1xf32>
    %188 = arith.divf %186, %187 : vector<8x1xf32>
    %189 = vector.broadcast %181 : vector<8x1xf32> to vector<8x32xf32>
    %190 = arith.subf %175, %189 : vector<8x32xf32>
    %cst_99 = arith.constant 9.99999996E-13 : f32
    %191 = vector.broadcast %cst_99 : f32 to vector<8x1xf32>
    %192 = arith.addf %188, %191 : vector<8x1xf32>
    %193 = math.rsqrt %192 : vector<8x1xf32>
    %194 = vector.broadcast %193 : vector<8x1xf32> to vector<8x32xf32>
    %195 = arith.mulf %190, %194 : vector<8x32xf32>
    %196 = vector.broadcast %176 : vector<1x32xf32> to vector<8x32xf32>
    %197 = arith.mulf %195, %196 : vector<8x32xf32>
    %198 = vector.broadcast %177 : vector<1x32xf32> to vector<8x32xf32>
    %199 = arith.addf %197, %198 : vector<8x32xf32>
    %c0_100 = arith.constant 0 : index
    %c0_101 = arith.constant 0 : index
    %c0_102 = arith.constant 0 : index
    %200 = vector.load %arg18[%c0_100, %c0_101, %c0_102] : memref<1x8x32xf32, #tpu.memory_space<vmem>>, vector<1x8x32xf32>
    %201 = vector.shape_cast %200 : vector<1x8x32xf32> to vector<8x32xf32>
    %202 = vector.shape_cast %199 : vector<8x32xf32> to vector<1x8x32xf32>
    tpu.vector_store %arg18[%c0_100, %c0_101, %c0_102], %202 {strides = array<i32>} : memref<1x8x32xf32, #tpu.memory_space<vmem>>, vector<1x8x32xf32>,
    return
  }
  func.func @transform_0(%arg0: i32, %arg1: i32) -> (i32, i32, i32) {
    %c0_i32 = arith.constant 0 : i32
    %c0_i32_0 = arith.constant 0 : i32
    %c0_i32_1 = arith.constant 0 : i32
    return %arg0, %c0_i32, %c0_i32_0 : i32, i32, i32
  }
  func.func @transform_1(%arg0: i32, %arg1: i32) -> (i32, i32, i32) {
    %c0_i32 = arith.constant 0 : i32
    %c0_i32_0 = arith.constant 0 : i32
    %c0_i32_1 = arith.constant 0 : i32
    return %arg0, %c0_i32, %c0_i32_0 : i32, i32, i32
  }
  func.func @transform_2(%arg0: i32, %arg1: i32) -> (i32, i32) {
    %c0_i32 = arith.constant 0 : i32
    %c0_i32_0 = arith.constant 0 : i32
    %c0_i32_1 = arith.constant 0 : i32
    return %c0_i32, %c0_i32_0 : i32, i32
  }
  func.func @transform_3(%arg0: i32, %arg1: i32) -> (i32, i32) {
    %c0_i32 = arith.constant 0 : i32
    %c0_i32_0 = arith.constant 0 : i32
    %c0_i32_1 = arith.constant 0 : i32
    return %c0_i32, %c0_i32_0 : i32, i32
  }
  func.func @transform_4(%arg0: i32, %arg1: i32) -> (i32, i32) {
    %c0_i32 = arith.constant 0 : i32
    %c0_i32_0 = arith.constant 0 : i32
    %c0_i32_1 = arith.constant 0 : i32
    return %c0_i32, %c0_i32_0 : i32, i32
  }
  func.func @transform_5(%arg0: i32, %arg1: i32) -> (i32, i32) {
    %c0_i32 = arith.constant 0 : i32
    %c0_i32_0 = arith.constant 0 : i32
    %c0_i32_1 = arith.constant 0 : i32
    return %c0_i32, %c0_i32_0 : i32, i32
  }
  func.func @transform_6(%arg0: i32, %arg1: i32) -> (i32, i32) {
    %c0_i32 = arith.constant 0 : i32
    %c0_i32_0 = arith.constant 0 : i32
    %c0_i32_1 = arith.constant 0 : i32
    return %c0_i32, %c0_i32_0 : i32, i32
  }
  func.func @transform_7(%arg0: i32, %arg1: i32) -> (i32, i32) {
    %c0_i32 = arith.constant 0 : i32
    %c0_i32_0 = arith.constant 0 : i32
    %c0_i32_1 = arith.constant 0 : i32
    return %c0_i32, %c0_i32_0 : i32, i32
  }
  func.func @transform_8(%arg0: i32, %arg1: i32) -> (i32, i32) {
    %c0_i32 = arith.constant 0 : i32
    %c0_i32_0 = arith.constant 0 : i32
    %c0_i32_1 = arith.constant 0 : i32
    return %c0_i32, %c0_i32_0 : i32, i32
  }
  func.func @transform_9(%arg0: i32, %arg1: i32) -> (i32, i32) {
    %c0_i32 = arith.constant 0 : i32
    %c0_i32_0 = arith.constant 0 : i32
    %c0_i32_1 = arith.constant 0 : i32
    return %c0_i32, %c0_i32_0 : i32, i32
  }
  func.func @transform_10(%arg0: i32, %arg1: i32) -> (i32, i32) {
    %c0_i32 = arith.constant 0 : i32
    %c0_i32_0 = arith.constant 0 : i32
    %c0_i32_1 = arith.constant 0 : i32
    return %c0_i32, %c0_i32_0 : i32, i32
  }
  func.func @transform_11(%arg0: i32, %arg1: i32) -> (i32, i32) {
    %c0_i32 = arith.constant 0 : i32
    %c0_i32_0 = arith.constant 0 : i32
    %c0_i32_1 = arith.constant 0 : i32
    return %c0_i32, %c0_i32_0 : i32, i32
  }
  func.func @transform_12(%arg0: i32, %arg1: i32) -> (i32, i32) {
    %c0_i32 = arith.constant 0 : i32
    %c0_i32_0 = arith.constant 0 : i32
    %c0_i32_1 = arith.constant 0 : i32
    return %c0_i32, %c0_i32_0 : i32, i32
  }
  func.func @transform_13(%arg0: i32, %arg1: i32) -> (i32, i32) {
    %c0_i32 = arith.constant 0 : i32
    %c0_i32_0 = arith.constant 0 : i32
    %c0_i32_1 = arith.constant 0 : i32
    return %c0_i32, %c0_i32_0 : i32, i32
  }
  func.func @transform_14(%arg0: i32, %arg1: i32) -> (i32, i32) {
    %c0_i32 = arith.constant 0 : i32
    %c0_i32_0 = arith.constant 0 : i32
    %c0_i32_1 = arith.constant 0 : i32
    return %c0_i32, %c0_i32_0 : i32, i32
  }
  func.func @transform_15(%arg0: i32, %arg1: i32) -> (i32, i32) {
    %c0_i32 = arith.constant 0 : i32
    %c0_i32_0 = arith.constant 0 : i32
    %c0_i32_1 = arith.constant 0 : i32
    return %c0_i32, %c0_i32_0 : i32, i32
  }
  func.func @transform_16(%arg0: i32, %arg1: i32) -> (i32, i32, i32) {
    %c0_i32 = arith.constant 0 : i32
    %c0_i32_0 = arith.constant 0 : i32
    return %arg0, %arg1, %c0_i32 : i32, i32, i32
  }
}

</mosaic_0001>

<bundles_post_ra>
// kernel: tpu_custom_call.1
= control target key start
LH: loop header
LB: loop body
LE: loop exit
PB: predicated region body
PF: predicated region fallthrough
CT: control target
= control target key end

     0   :  { %s2366_s0 = inlined_call_operand.vmem [shape: bf16[2,8,32], index: 0, kind: input, shape index: {}]   ;;  %s2367_s1 = inlined_call_operand.vmem [shape: f32[2,1,8], index: 1, kind: input, shape index: {}]   ;;  %s2368_s2 = inlined_call_operand.vmem [shape: bf16[32,32], index: 2, kind: input, shape index: {}]   ;;  %s2369_s3 = inlined_call_operand.vmem [shape: f32[1,32], index: 3, kind: input, shape index: {}]   ;;  %s2370_s4 = inlined_call_operand.vmem [shape: bf16[32,64], index: 4, kind: input, shape index: {}]   ;;  %s2371_s5 = inlined_call_operand.vmem [shape: f32[1,64], index: 5, kind: input, shape index: {}]   ;;  %s2372_s6 = inlined_call_operand.vmem [shape: bf16[32,32], index: 6, kind: input, shape index: {}]   ;;  %s2373_s7 = inlined_call_operand.vmem [shape: f32[1,32], index: 7, kind: input, shape index: {}]   ;;  %s2374_s8 = inlined_call_operand.vmem [shape: f32[1,32], index: 8, kind: input, shape index: {}]   ;;  %s2375_s9 = inlined_call_operand.vmem [shape: f32[1,32], index: 9, kind: input, shape index: {}]   ;;  %s2376_s10 = inlined_call_operand.vmem [shape: bf16[32,128], index: 10, kind: input, shape index: {}]   ;;  %s2377_s11 = inlined_call_operand.vmem [shape: f32[1,128], index: 11, kind: input, shape index: {}]   ;;  %s2378_s12 = inlined_call_operand.vmem [shape: bf16[128,32], index: 12, kind: input, shape index: {}]   ;;  %s2379_s13 = inlined_call_operand.vmem [shape: f32[1,32], index: 13, kind: input, shape index: {}]   ;;  %s2380_s14 = inlined_call_operand.vmem [shape: f32[1,32], index: 14, kind: input, shape index: {}]   ;;  %s2381_s15 = inlined_call_operand.vmem [shape: f32[1,32], index: 15, kind: input, shape index: {}]   ;;  %s2382_s16 = inlined_call_operand.hbm [shape: f32[2,8,32], index: 16, kind: output, shape index: {}]  }
   0x1   :  { %2386 = sst [smem:[#allocation13_spill]] %s2366_s0 }
   0x2   :  { %2387 = sst [smem:[#allocation14_spill]] %s2367_s1 }
   0x3   :  { %2388 = sst [smem:[#allocation15_spill]] %s2368_s2 }
   0x4   :  { %2389 = sst [smem:[#allocation16_spill]] %s2369_s3 }
   0x5   :  { %2390 = sst [smem:[#allocation17_spill]] %s2370_s4 }
   0x6   :  { %21 = vsyncpa [#allocation7], 0 }
   0x7   :  { %23 = vsyncpa [#allocation7 + $0x1], 0  ;;  %s2079_s21 = smov 0   ;;  %s2081_s22 = smov 0  }
   0x8   :  { %s2083_s23 = smov 0   ;;  %s2085_s24 = smov 0  }
   0x9   :  { %s2087_s25 = smov 0   ;;  %s2089_s26 = smov 0  }
   0xa LB: > { %2391 = sst [smem:[#allocation9_spill]] %s1970_s23  ;;  %s1608_s27 = sadd.s32 4294967295, %s1982_s26   ;;  %s1982_s26 = sphi %s2089_s26, %s29_s26   ;;  %s1978_s25 = sphi %s2087_s25, %s2405_s25   ;;  %s1974_s24 = sphi %s2085_s24, %s2404_s24   ;;  %s1970_s23 = sphi %s2083_s23, %s2403_s23   ;;  %s1966_s22 = sphi %s2081_s22, %s2407_s22   ;;  %s1962_s21 = sphi %s2079_s21, %s2406_s21  }
   0xb   : > { %2392 = sst [smem:[#allocation10_spill]] %s1978_s25  ;;  %s1609_s28 = sadd.s32 4294967294, %s1982_s26  }
   0xc   : > { %s41_s29 = sadd.s32 1, %s1978_s25  ;;  %s396_s30 = sadd.s32 1, %s1970_s23 }
   0xd   : > { %p43_p0 = scmp.ge.s32.totalorder %s41_s29, 2  ;;  %p406_p1 = scmp.ne.s32.totalorder %s1970_s23, %s1966_s22 }
   0xe   : > { %p407_p2 = scmp.eq.s32.totalorder %s1608_s27, 1  ;;  %p412_p3 = scmp.ne.s32.totalorder %s1966_s22, %s1962_s21 }
   0xf   : > { %s2409_s29 = smov (%p43_p0, %s41_s29), 0  ;;  %p413_p5 = scmp.eq.s32.totalorder %s1609_s28, 1 }
  0x10   : > { %2393 = sst [smem:[#allocation11_spill]] %s2409_s29  ;;  %p2119_p4 = por %p407_p2, %p406_p1 }
  0x11   : > { %s391_s17 = ssub.s32 %s1978_s25, %s2409_s29  ;;  %p1612_p6 = scmp.ge.s32.totalorder %s1982_s26, 1 }
  0x12   : > { %p394_p7 = scmp.eq.s32.totalorder %s391_s17, 0  ;;  %p2126_p8 = por %p413_p5, %p412_p3 }
  0x13   : > { %p486_p9 = scmp.lt.s32.totalorder %s1982_s26, 3 }
  0x14   : > { %s2132_s19 = scalar_select %p394_p7, %s1970_s23, %s396_s30  }
  0x15   : > { %p487_p10 = pnand %p1612_p6, %p486_p9 }
  0x16   : > { %2396 = sst [smem:[#allocation12_spill]] %s2132_s19  ;;  %p538_p11 = scmp.lt.s32.totalorder (!%p487_p10), %s1974_s24, 1 }
  0x17   : > { %490 = sbr.rel (%p487_p10) target bundleno = 2333 (0x91d), region = 84  ;;  %s2397_s4 = sld [smem:[#allocation17_spill]] (!%p487_p10) }
  0x18   : > { %s2398_s2 = sld [smem:[#allocation15_spill]] (!%p487_p10)  ;;  %s1986_s19 = smov (!%p487_p10), 112  }
  0x19   : > { %s2400_s3 = sld [smem:[#allocation16_spill]] (!%p487_p10)  ;;  %s1988_s27 = smov (!%p487_p10), 104  }
  0x1a   : > { %s1989_s28 = smov (!%p487_p10), 96   ;;  %s2401_s1 = sld [smem:[#allocation14_spill]] (!%p487_p10) }
  0x1b   : > { %s535_s17 = sand.u32 (!%p487_p10), 1, %s1966_s22  }
  0x1c   : > { %v1984_v1 = vmov 0.0   ;;  %vm1985_vm0 = vmmov 0   ;;  %s2149_s30 = scalar_select %p538_p11, %s1974_s24, 1  ;;  %vm574_vm1 = vcmask 261120   ;;  %v1615_v7 = vld [vmem:[%s2371_s5] ss:$0 sm:$0xff] }
  0x1d   : > { %v1863_v0 = vld [vmem:[%s2397_s4 + $0x8] sm:$0xff]   ;;  %1699 = vmatprep.subr.bf16.mxu1 %v1984_v1  ;;  %1727 = vmatprep.subr.bf16.mxu0 %v1984_v1  ;;  %v1864_v2 = vld [vmem:[%s2397_s4] sm:$0xff]   ;;  %s2399_s4 = sld [smem:[#allocation13_spill]]  ;;  %vm619_vm2 = vcmask 257024   ;;  %vm715_vm3 = vcmask 64512   ;;  %vm776_vm4 = vcmask 1043456  }
  0x1e   : > { %1700 = vmatpush3.bf16.msra.mxu1 %v1863_v0  ;;  %1703 = vmatprep.mubr.msk.bf16.mxu1 %vm1985_vm0, %v1984_v1  ;;  %s1614_s20 = sshll.u32 %s2149_s30, 2  ;;  %v1865_v3 = vld [vmem:[%s2398_s2 + $0x8] sm:$0xff]   ;;  %v1866_v5 = vld [vmem:[%s2398_s2] sm:$0xff]   ;;  %vm1173_vm5 = vcmask 130048   ;;  %vm1175_vm6 = vcmask 195584  }
  0x1f   : > { %1701 = vmatprep.subr.bf16.mxu1 %v1984_v1  ;;  %1729 = vmatprep.mubr.msk.bf16.mxu0 %vm1985_vm0, %v1984_v1  ;;  %v1620_v14 = vld [vmem:[%s2400_s3] ss:$0 sm:$0xff]  ;;  %s1515_s3 = scalar_lea.sflag [#allocation7], %s535_s17 }
  0x20   : > { %s544_s23 = scalar_lea.vmem %s2401_s1, %s2149_s30  ;;  %s1990_s30 = smov 8  }
  0x21   : > { %v1624_v39 = vld [vmem:[%s544_s23] ss:$0 sm:$0xff] }
  0x22   : > { %1702 = vmatpush3.bf16.msra.mxu1 %v1864_v2 }
  0x23   : > { %s541_s25 = scalar_lea.vmem %s2399_s4, %s1614_s20  ;;  %1707 = vmatprep.subr.bf16.mxu1 %v1984_v1  ;;  %s1987_s20 = smov 120  }
  0x24   : > { %v550_v4 = vld [vmem:[%s541_s25] sm:$0xf]  ;;  %s1613_s4 = sshll.u32 %s535_s17, 3 }
  0x25   : > { %1704 = vmatmul.mubr.msk.bf16.vlgmr.msra.gmra.mxu1 %vm574_vm1, %v550_v4  ;;  %v2166_v6 = vld [vmem:[%s541_s25] sm:$0xf] }
  0x26   : > { %1708 = vmatpush3.bf16.msra.mxu1 %v1865_v3  ;;  %1711 = vmatprep.mubr.msk.bf16.mxu1 %vm1985_vm0, %v1984_v1 }
  0x27   : > { %1709 = vmatprep.subr.bf16.mxu1 %v1984_v1 }
  0x2a   : > { %1710 = vmatpush3.bf16.msra.mxu1 %v1866_v5 }
  0x2b   : > { %1715 = vmatprep.subr.bf16.mxu1 %v1984_v1 }
  0x2d   : > { %1712 = vmatmul.mubr.msk.bf16.vlgmr.msra.gmra.mxu1 %vm574_vm1, %v2166_v6 }
  0x2e   : > { %1717 = vmatprep.mubr.msk.bf16.mxu1 %vm1985_vm0, %v1984_v1 }
  0xe5   : > { %v612_v8 = vpop.f32.mrf.mxu1 }
  0xe6   : > { %v613_v9 = vadd.f32 %v1615_v7, %v612_v8 }
  0xe7   : > { %v1705_v10 = vpop.f32.mrf.mxu1 }
  0xe8   : > { %v618_v11 = vpack.c.bf16 %v613_v9, %v613_v9 }
  0xe9   : > { %v615_v12 = vpop.f32.mrf.mxu1 }
  0xea   : > { %620 = vst.msk [vmem:[#allocation3] sm:$0xf] %vm619_vm2, %v618_v11 }
  0xeb   : > { %v1706_v13 = vpop.f32.mrf.mxu1 }
  0xed   : > { %v695_v15 = vpop.f32.mrf.mxu1 }
  0xee   : > { %v696_v16 = vadd.f32 %v1620_v14, %v695_v15 }
  0xef   : > { %v1713_v17 = vpop.f32.mrf.mxu1 }
  0xf0   : > { %v701_v18 = vmul.f32 0.35355338, %v696_v16 }
  0xf1   : > { %v698_v19 = vpop.f32.mrf.mxu1  ;;  %v713_v20 = vld [vmem:[#allocation3] sm:$0xf] }
  0xf2   : > { %v702_v21 = vpack.c.bf16 %v701_v18, %v701_v18  ;;  %v720_v22 = vsel %vm715_vm3, %v713_v20, 0  ;;  %v1628_v23 = vcombine.low %v713_v20, %v713_v20 }
  0xf3   : > { %v1714_v24 = vpop.f32.mrf.mxu1  ;;  %1716 = vmatpush3.bf16.xpose.msra.mxu1 %v720_v22 }
  0xf4   : > { %704 = vst.msk [vmem:[#allocation2] sm:$0xf] %vm619_vm2, %v702_v21  ;;  %942 = vrot.lane.b32.xlu1 %v1628_v23, %s1986_s19  ;;  %829 = vrot.lane.b32.xlu0 %v1628_v23, %s1987_s20 }
  0xf5   : > { %1721 = vmatprep.subr.bf16.mxu1 %v1984_v1 }
  0xfb   : > { %v712_v25 = vld [vmem:[#allocation2] sm:$0xf] }
  0xfc   : > { %1718 = vmatmul.mubr.msk.bf16.vlgmr.msra.gmra.mxu1 %vm715_vm3, %v712_v25  ;;  %v1627_v26 = vcombine.low %v712_v25, %v712_v25 }
  0xfd   : > { %1723 = vmatprep.mubr.msk.bf16.mxu1 %vm1985_vm0, %v1984_v1 }
  0xfe   : > { %940 = vrot.lane.b32.xlu1 %v1627_v26, %s1986_s19  ;;  %824 = vrot.lane.b32.xlu0 %v1627_v26, %s1987_s20 }
 0x102   : > { %1050 = vrot.lane.b32.xlu1 %v1627_v26, %s1988_s27  ;;  %1052 = vrot.lane.b32.xlu0 %v1628_v23, %s1988_s27 }
 0x106   : > { %624 = vrot.lane.b32.xlu0 %v618_v11, %s1989_s28  ;;  %s1992_s28 = smov 24  }
 0x166   : > { %v830_v27 = vpop.permute.xlu0 %829  ;;  %v943_v29 = vpop.permute.xlu1 %942 }
 0x167   : > { %v835_v28 = vsel %vm715_vm3, %v830_v27, 0  ;;  %v948_v31 = vsel %vm715_vm3, %v943_v29, 0 }
 0x168   : > { %1728 = vmatpush3.bf16.xpose.msra.mxu0 %v835_v28 }
 0x169   : > { %1739 = vmatprep.subr.bf16.mxu0 %v1984_v1 }
 0x170   : > { %v825_v30 = vpop.permute.xlu0 %824  ;;  %v941_v33 = vpop.permute.xlu1 %940 }
 0x171   : > { %1730 = vmatmul.mubr.msk.bf16.vlgmr.msra.gmra.mxu0 %vm715_vm3, %v825_v30 }
 0x172   : > { %1740 = vmatpush3.bf16.xpose.msra.mxu0 %v948_v31  ;;  %1741 = vmatprep.mubr.msk.bf16.mxu0 %vm1985_vm0, %v1984_v1 }
 0x173   : > { %1751 = vmatprep.subr.bf16.mxu0 %v1984_v1 }
 0x174   : > { %v1053_v32 = vpop.permute.xlu0 %1052  ;;  %v1051_v36 = vpop.permute.xlu1 %1050 }
 0x175   : > { %v1058_v35 = vsel %vm715_vm3, %v1053_v32, 0 }
 0x178   : > { %v625_v34 = vpop.permute.xlu0 %624 }
 0x179   : > { %627 = vst.msk [vmem:[#allocation4] sm:$0xf] %vm619_vm2, %v625_v34  ;;  %1742 = vmatmul.mubr.msk.bf16.vlgmr.msra.gmra.mxu0 %vm715_vm3, %v941_v33 }
 0x17a   : > { %1752 = vmatpush3.bf16.xpose.msra.mxu0 %v1058_v35  ;;  %1753 = vmatprep.mubr.msk.bf16.mxu0 %vm1985_vm0, %v1984_v1 }
 0x17b   : > { %1763 = vmatprep.subr.bf16.mxu0 %v1984_v1 }
 0x180   : > { %v714_v37 = vld [vmem:[#allocation4] sm:$0xf] }
 0x181   : > { %1754 = vmatmul.mubr.msk.bf16.vlgmr.msra.gmra.mxu0 %vm715_vm3, %v1051_v36  ;;  %v778_v38 = vsel %vm776_vm4, %v714_v37, 0  ;;  %v1630_v46 = vcombine.low %v714_v37, %v714_v37 }
 0x182   : > { %1722 = vmatpush3.bf16.msra.mxu1 %v778_v38  ;;  %1767 = vmatprep.mubr.msk.bf16.mxu0 %vm1985_vm0, %v1984_v1 }
 0x183   : > { %1733 = vmatprep.subr.bf16.mxu1 %v1984_v1 }
 0x1bc   : > { %v756_v40 = vpop.f32.mrf.mxu1 }
 0x1bd   : > { %v757_v41 = vadd.f32 %v1624_v39, %v756_v40 }
 0x1be   : > { %v1719_v42 = vpop.f32.mrf.mxu1 }
 0x1bf   : > { %v762_v43 = vsel %vm715_vm3, %v757_v41, -inf }
 0x1c0   : > { %763 = vmax.xlane.f32.xlu1 %v762_v43  ;;  %v759_v44 = vpop.f32.mrf.mxu1 }
 0x1c2   : > { %v1720_v45 = vpop.f32.mrf.mxu1 }
 0x1d1   : > { %1001 = vrot.lane.b32.xlu1 %v1630_v46, %s1986_s19  ;;  %s1991_s19 = smov 16  }
 0x231   : > { %v871_v47 = vpop.f32.mrf.mxu0 }
 0x232   : > { %v872_v48 = vadd.f32 %v1624_v39, %v871_v47 }
 0x233   : > { %v1731_v49 = vpop.f32.mrf.mxu0 }
 0x234   : > { %v877_v50 = vsel %vm715_vm3, %v872_v48, -inf  ;;  %v1870_v49 = vld [vmem:[%s2372_s6 + $0x8] sm:$0xff]  }
 0x235   : > { %878 = vmax.xlane.f32.xlu0 %v877_v50  ;;  %v874_v51 = vpop.f32.mrf.mxu0  ;;  %1764 = vmatpush3.bf16.msra.mxu0 %v1870_v49 }
 0x236   : > { %v1871_v51 = vld [vmem:[%s2372_s6] sm:$0xff]   ;;  %1765 = vmatprep.subr.bf16.mxu0 %v1984_v1 }
 0x237   : > { %v1732_v52 = vpop.f32.mrf.mxu0 }
 0x239   : > { %v984_v53 = vpop.f32.mrf.mxu0  ;;  %1766 = vmatpush3.bf16.msra.mxu0 %v1871_v51 }
 0x23a   : > { %v985_v54 = vadd.f32 %v1624_v39, %v984_v53  ;;  %1779 = vmatprep.subr.bf16.mxu0 %v1984_v1 }
 0x23b   : > { %v1743_v55 = vpop.f32.mrf.mxu0 }
 0x23c   : > { %v990_v56 = vsel %vm715_vm3, %v985_v54, -inf }
 0x23d   : > { %991 = vmax.xlane.f32.xlu0 %v990_v56  ;;  %v987_v57 = vpop.f32.mrf.mxu0 }
 0x23f   : > { %v1744_v58 = vpop.f32.mrf.mxu0 }
 0x241   : > { %v1094_v59 = vpop.f32.mrf.mxu0 }
 0x242   : > { %v1095_v60 = vadd.f32 %v1624_v39, %v1094_v59 }
 0x243   : > { %v1755_v61 = vpop.f32.mrf.mxu0 }
 0x244   : > { %v1100_v62 = vsel %vm715_vm3, %v1095_v60, -inf }
 0x245   : > { %v1097_v63 = vpop.f32.mrf.mxu0  ;;  %1101 = vmax.xlane.f32.xlu1 %v1100_v62 }
 0x247   : > { %v1756_v0 = vpop.f32.mrf.mxu0 }
 0x249   : > { %v764_v2 = vpop.xlane.xlu1 %763 }
 0x24a   : > { %v765_v3 = vsub.f32 %v757_v41, %v764_v2 }
 0x24c   : > { %v766_v4 = vmul.f32 1.442695, %v765_v3 }
 0x24d   : > { %v1002_v14 = vpop.permute.xlu1 %1001 }
 0x24e   : > { %1882 = vpow2.f32 %v766_v4  ;;  %v1007_v23 = vsel %vm776_vm4, %v1002_v14, 0 }
 0x253   : > { %891 = vrot.lane.b32.xlu0 %v1630_v46, %s1987_s20  ;;  %s537_s20 = scalar_lea.vmem [#allocation6], %s1613_s4 }
 0x256   : > { %1111 = vrot.lane.b32.xlu1 %v1630_v46, %s1988_s27  ;;  %s1529_s27 = sshll.u32 %s537_s20, 4  ;;  %s1530_s27 = int_to_ptr.vmem [resolvable:$true] %s1529_s27 }
 0x257   : > { %s1906_s23 = scalar_lea.vmem %s1530_s27, 128 }
 0x258   : > { %p1907_p12 = scmp.ne.s32.totalorder %s1530_s27, %s1906_s23 }
 0x25a   : > { %p1908_p13 = pnand %p1907_p12, %p2119_p4 }
 0x25b   : > { %v1883_v5 = vpop.eup %1882 }
 0x25c   : > { %v772_v7 = vpack.c.bf16 %v1883_v5, %v1883_v5  ;;  %v768_v32 = vsel %vm715_vm3, %v1883_v5, 0.0  ;;  %p1909_p0 = pneg %p1908_p13 }
 0x25e   : > { %1724 = vmatmul.mubr.msk.bf16.vlgmr.msra.gmra.mxu1 %vm715_vm3, %v772_v7 }
 0x25f   : > { %1735 = vmatprep.mubr.msk.bf16.mxu1 %vm1985_vm0, %v1984_v1 }
 0x2be   : > { %v879_v8 = vpop.xlane.xlu0 %878 }
 0x2bf   : > { %v880_v9 = vsub.f32 %v872_v48, %v879_v8 }
 0x2c1   : > { %v881_v10 = vmul.f32 1.442695, %v880_v9  ;;  %v1636_v9 = vld [vmem:[%s2373_s7] ss:$0 sm:$0xff] }
 0x2c3   : > { %1884 = vpow2.f32 %v881_v10  ;;  %v1246_v10 = vunpack.c.l.bf16 %v2166_v6  ;;  %v1872_v6 = vld [vmem:[%s2376_s10 + $0x8] sm:$0xff]  }
 0x2c6   : > { %v992_v11 = vpop.xlane.xlu0 %991 }
 0x2c7   : > { %v993_v12 = vsub.f32 %v985_v54, %v992_v11 }
 0x2c9   : > { %v994_v13 = vmul.f32 1.442695, %v993_v12 }
 0x2ca   : > { %v892_v15 = vpop.permute.xlu0 %891 }
 0x2cb   : > { %1886 = vpow2.f32 %v994_v13  ;;  %v897_v16 = vsel %vm776_vm4, %v892_v15, 0 }
 0x2cc   : > { %1734 = vmatpush3.bf16.msra.mxu1 %v897_v16 }
 0x2cd   : > { %1745 = vmatprep.subr.bf16.mxu1 %v1984_v1 }
 0x2ce   : > { %v1102_v17 = vpop.xlane.xlu1 %1101 }
 0x2cf   : > { %v1103_v18 = vsub.f32 %v1095_v60, %v1102_v17 }
 0x2d0   : > { %v1885_v19 = vpop.eup %1884 }
 0x2d1   : > { %v1104_v20 = vmul.f32 1.442695, %v1103_v18  ;;  %v883_v21 = vsel %vm715_vm3, %v1885_v19, 0.0  ;;  %v887_v22 = vpack.c.bf16 %v1885_v19, %v1885_v19 }
 0x2d2   : > { %884 = vadd.xlane.f32.xlu0 %v883_v21  ;;  %v1112_v25 = vpop.permute.xlu1 %1111 }
 0x2d3   : > { %1888 = vpow2.f32 %v1104_v20  ;;  %1736 = vmatmul.mubr.msk.bf16.vlgmr.msra.gmra.mxu1 %vm715_vm3, %v887_v22  ;;  %v1117_v28 = vsel %vm776_vm4, %v1112_v25, 0 }
 0x2d4   : > { %1746 = vmatpush3.bf16.msra.mxu1 %v1007_v23  ;;  %1747 = vmatprep.mubr.msk.bf16.mxu1 %vm1985_vm0, %v1984_v1  ;;  %v1873_v23 = vld [vmem:[%s2376_s10] sm:$0xff]  }
 0x2d5   : > { %1757 = vmatprep.subr.bf16.mxu1 %v1984_v1 }
 0x2d8   : > { %v1887_v24 = vpop.eup %1886 }
 0x2d9   : > { %v996_v26 = vsel %vm715_vm3, %v1887_v24, 0.0  ;;  %v1000_v27 = vpack.c.bf16 %v1887_v24, %v1887_v24 }
 0x2da   : > { %997 = vadd.xlane.f32.xlu1 %v996_v26 }
 0x2db   : > { %1748 = vmatmul.mubr.msk.bf16.vlgmr.msra.gmra.mxu1 %vm715_vm3, %v1000_v27 }
 0x2dc   : > { %1758 = vmatpush3.bf16.msra.mxu1 %v1117_v28  ;;  %1759 = vmatprep.mubr.msk.bf16.mxu1 %vm1985_vm0, %v1984_v1  ;;  %v1640_v28 = vld [vmem:[%s2374_s8] ss:$0 sm:$0xff] }
 0x2dd   : > { %1771 = vmatprep.subr.bf16.mxu1 %v1984_v1 }
 0x2e0   : > { %v1889_v29 = vpop.eup %1888 }
 0x2e1   : > { %v1106_v30 = vsel %vm715_vm3, %v1889_v29, 0.0  ;;  %v1110_v31 = vpack.c.bf16 %v1889_v29, %v1889_v29 }
 0x2e2   : > { %1107 = vadd.xlane.f32.xlu0 %v1106_v30  ;;  %v1641_v30 = vld [vmem:[%s2375_s9] ss:$0 sm:$0xff] }
 0x2e3   : > { %1760 = vmatmul.mubr.msk.bf16.vlgmr.msra.gmra.mxu1 %vm715_vm3, %v1110_v31 }
 0x2e4   : > { %1775 = vmatprep.mubr.msk.bf16.mxu1 %vm1985_vm0, %v1984_v1  ;;  %1772 = vmatpush3.bf16.msra.mxu1 %v1872_v6 }
 0x2e5   : > { %1773 = vmatprep.subr.bf16.mxu1 %v1984_v1 }
 0x2e6   : > { %769 = vadd.xlane.f32.xlu0 %v768_v32 }
 0x2e8   : > { %1774 = vmatpush3.bf16.msra.mxu1 %v1873_v23 }
 0x31e   : > { %v814_v33 = vpop.f32.mrf.mxu1 }
 0x320   : > { %v1725_v34 = vpop.f32.mrf.mxu1 }
 0x321   : > { %v1874_v34 = vld [vmem:[%s2378_s12 + $0x38] sm:$0xff]  }
 0x322   : > { %v817_v35 = vpop.f32.mrf.mxu1 }
 0x323   : > { %v1875_v35 = vld [vmem:[%s2378_s12 + $0x30] sm:$0xff]  }
 0x324   : > { %v1726_v36 = vpop.f32.mrf.mxu1 }
 0x325   : > { %v1876_v36 = vld [vmem:[%s2378_s12 + $0x28] sm:$0xff]  }
 0x35b   : > { %v885_v37 = vpop.xlane.xlu0 %884 }
 0x35c   : > { %1890 = vrcp.f32 %v885_v37  ;;  %v1877_v37 = vld [vmem:[%s2378_s12 + $0x20] sm:$0xff]  }
 0x363   : > { %v998_v38 = vpop.xlane.xlu1 %997 }
 0x364   : > { %1892 = vrcp.f32 %v998_v38  ;;  %v1878_v38 = vld [vmem:[%s2378_s12 + $0x18] sm:$0xff]  }
 0x369   : > { %v1891_v39 = vpop.eup %1890 }
 0x36b   : > { %v1108_v40 = vpop.xlane.xlu0 %1107 }
 0x36c   : > { %1894 = vrcp.f32 %v1108_v40  ;;  %v1880_v40 = vld [vmem:[%s2378_s12 + $0x8] sm:$0xff]  }
 0x36f   : > { %v770_v60 = vpop.xlane.xlu0 %769 }
 0x370   : > { %1896 = vrcp.f32 %v770_v60 }
 0x371   : > { %v1893_v46 = vpop.eup %1892 }
 0x379   : > { %v1895_v54 = vpop.eup %1894 }
 0x37d   : > { %v1897_v61 = vpop.eup %1896 }
 0x37e   : > { %v820_v63 = vmul.f32 %v1897_v61, %v814_v33 }
 0x393   : > { %v933_v41 = vpop.f32.mrf.mxu1 }
 0x394   : > { %v939_v42 = vmul.f32 %v1891_v39, %v933_v41  ;;  %v1879_v39 = vld [vmem:[%s2378_s12 + $0x10] sm:$0xff]   ;;  %v1881_v41 = vld [vmem:[%s2378_s12] sm:$0xff]  }
 0x395   : > { %v1737_v43 = vpop.f32.mrf.mxu1 }
 0x396   : > { %1161 = vrot.lane.b32.xlu1 %v939_v42, %s1990_s30  ;;  %v1642_v42 = vld [vmem:[%s2377_s11] ss:$0 sm:$0xff]  ;;  %s1993_s30 = smov [#allocation6]  }
 0x397   : > { %v936_v44 = vpop.f32.mrf.mxu1  ;;  %s1910_s25 = sshll.u32 %s1993_s30, 4  ;;  %s1911_s25 = int_to_ptr.vmem [resolvable:$false] %s1910_s25 }
 0x398   : > { %p1913_p1 = scmp.lt.s32.totalorder %s1530_s27, %s1911_s25 }
 0x399   : > { %v1738_v45 = vpop.f32.mrf.mxu1 }
 0x39b   : > { %v1043_v47 = vpop.f32.mrf.mxu1 }
 0x39c   : > { %v1049_v48 = vmul.f32 %v1893_v46, %v1043_v47 }
 0x39d   : > { %v1749_v50 = vpop.f32.mrf.mxu1 }
 0x39e   : > { %1165 = vrot.lane.b32.xlu0 %v1049_v48, %s1991_s19  ;;  %s1658_s19 = sshll.u32 %s1974_s24, 7  ;;  %s1912_s24 = scalar_lea.vmem %s1911_s25, 256 }
 0x39f   : > { %v1046_v52 = vpop.f32.mrf.mxu1  ;;  %s1527_s2 = scalar_lea.hbm %s2382_s16, %s1658_s19  ;;  %p1914_p2 = scmp.lt.s32.totalorder %s1912_s24, %s1906_s23 }
 0x3a1   : > { %v1750_v53 = vpop.f32.mrf.mxu1  ;;  %p1915_p3 = por %p1914_p2, %p1913_p1 }
 0x3a3   : > { %v1153_v55 = vpop.f32.mrf.mxu1  ;;  %p1916_p5 = pnand %p1915_p3, %p1909_p0 }
 0x3a4   : > { %v1159_v56 = vmul.f32 %v1895_v54, %v1153_v55 }
 0x3a5   : > { %v1761_v57 = vpop.f32.mrf.mxu1 }
 0x3a6   : > { %1169 = vrot.lane.b32.xlu1 %v1159_v56, %s1992_s28 }
 0x3a7   : > { %v1156_v58 = vpop.f32.mrf.mxu1 }
 0x3a9   : > { %v1762_v59 = vpop.f32.mrf.mxu1 }
 0x408   : > { %v1162_v62 = vpop.permute.xlu1 %1161 }
 0x409   : > { %v1172_v2 = vsel %vm715_vm3, %v820_v63, %v1162_v62 }
 0x410   : > { %v1166_v0 = vpop.permute.xlu0 %1165 }
 0x411   : > { %v1174_v3 = vsel %vm1173_vm5, %v1172_v2, %v1166_v0 }
 0x418   : > { %v1170_v4 = vpop.permute.xlu1 %1169 }
 0x419   : > { %v1176_v5 = vsel %vm1175_vm6, %v1174_v3, %v1170_v4 }
 0x41a   : > { %v1177_v7 = vpack.c.bf16 %v1176_v5, %v1176_v5 }
 0x41c   : > { %1178 = vst.msk [vmem:[#allocation5] sm:$0xf] %vm619_vm2, %v1177_v7 }
 0x423   : > { %v1179_v8 = vld [vmem:[#allocation5] sm:$0xf] }
 0x424   : > { %1768 = vmatmul.mubr.msk.bf16.vlgmr.msra.gmra.mxu0 %vm574_vm1, %v1179_v8 }
 0x425   : > { %1795 = vmatprep.mubr.msk.bf16.mxu0 %vm1985_vm0, %v1984_v1  ;;  %1780 = vmatpush3.bf16.msra.mxu0 %v1874_v34 }
 0x426   : > { %1781 = vmatprep.subr.bf16.mxu0 %v1984_v1 }
 0x429   : > { %1782 = vmatpush3.bf16.msra.mxu0 %v1875_v35 }
 0x42a   : > { %1783 = vmatprep.subr.bf16.mxu0 %v1984_v1 }
 0x42d   : > { %1784 = vmatpush3.bf16.msra.mxu0 %v1876_v36 }
 0x42e   : > { %1785 = vmatprep.subr.bf16.mxu0 %v1984_v1 }
 0x431   : > { %1786 = vmatpush3.bf16.msra.mxu0 %v1877_v37 }
 0x432   : > { %1787 = vmatprep.subr.bf16.mxu0 %v1984_v1 }
 0x435   : > { %1788 = vmatpush3.bf16.msra.mxu0 %v1878_v38 }
 0x436   : > { %1789 = vmatprep.subr.bf16.mxu0 %v1984_v1 }
 0x439   : > { %1790 = vmatpush3.bf16.msra.mxu0 %v1879_v39 }
 0x43a   : > { %1791 = vmatprep.subr.bf16.mxu0 %v1984_v1 }
 0x43d   : > { %1792 = vmatpush3.bf16.msra.mxu0 %v1880_v40 }
 0x43e   : > { %1793 = vmatprep.subr.bf16.mxu0 %v1984_v1 }
 0x441   : > { %1794 = vmatpush3.bf16.msra.mxu0 %v1881_v41 }
 0x4e4   : > { %v1240_v11 = vpop.f32.mrf.mxu0 }
 0x4e5   : > { %v1241_v12 = vadd.f32 %v1636_v9, %v1240_v11  ;;  %v1646_v11 = vld [vmem:[%s2379_s13] ss:$0 sm:$0xff] }
 0x4e6   : > { %v1769_v13 = vpop.f32.mrf.mxu0 }
 0x4e7   : > { %v1247_v14 = vadd.f32 %v1246_v10, %v1241_v12 }
 0x4e8   : > { %v1243_v15 = vpop.f32.mrf.mxu0 }
 0x4e9   : > { %v1250_v16 = vsel %vm574_vm1, %v1247_v14, 0.0 }
 0x4ea   : > { %1251 = vadd.xlane.f32.xlu1 %v1250_v16  ;;  %v1770_v17 = vpop.f32.mrf.mxu0 }
 0x573   : > { %v1252_v18 = vpop.xlane.xlu1 %1251 }
 0x574   : > { %v1254_v19 = vmul.f32 0.03125, %v1252_v18 }
 0x576   : > { %v1255_v20 = vsub.f32 %v1247_v14, %v1254_v19 }
 0x578   : > { %v1256_v21 = vmul.f32 %v1255_v20, %v1255_v20 }
 0x57a   : > { %v1257_v22 = vsel %vm574_vm1, %v1256_v21, 0.0 }
 0x57b   : > { %1258 = vadd.xlane.f32.xlu0 %v1257_v22 }
 0x604   : > { %v1259_v24 = vpop.xlane.xlu0 %1258 }
 0x605   : > { %v1260_v25 = vmul.f32 0.03125, %v1259_v24 }
 0x607   : > { %v1261_v26 = vadd.f32 1e-12, %v1260_v25 }
 0x609   : > { %1898 = vrsqrt.f32 %v1261_v26 }
 0x616   : > { %v1899_v27 = vpop.eup %1898 }
 0x617   : > { %v1263_v29 = vmul.f32 %v1899_v27, %v1255_v20  ;;  %v1655_v27 = vld [vmem:[%s2380_s14] ss:$0 sm:$0xff] }
 0x619   : > { %v1270_v31 = vmul.f32 %v1640_v28, %v1263_v29  ;;  %v1656_v29 = vld [vmem:[%s2381_s15] ss:$0 sm:$0xff] }
 0x61b   : > { %v2275_v32 = vadd.f32 %v1641_v30, %v1270_v31 }
 0x61d   : > { %v1278_v33 = vpack.c.bf16 %v2275_v32, %v2275_v32 }
 0x61f   : > { %1776 = vmatmul.mubr.msk.bf16.vlgmr.msra.gmra.mxu1 %vm574_vm1, %v1278_v33 }
 0x6df   : > { %v1339_v43 = vpop.f32.mrf.mxu1 }
 0x6e0   : > { %v1340_v44 = vadd.f32 %v1642_v42, %v1339_v43 }
 0x6e1   : > { %v1777_v45 = vpop.f32.mrf.mxu1 }
 0x6e2   : > { %v1346_v46 = vmul.f32 0.70710677, %v1340_v44  ;;  %v1345_v7 = vmul.f32 0.5, %v1340_v44 }
 0x6e3   : > { %v1342_v47 = vpop.f32.mrf.mxu1 }
 0x6e4   : > { %v1347_v48 = vand.u32 2147483647, %v1346_v46  ;;  %vm1366_vm7 = vcmp.ge.f32.partialorder %v1346_v46, 0.0 }
 0x6e5   : > { %v1778_v49 = vpop.f32.mrf.mxu1 }
 0x6e6   : > { %v1348_v50 = vmul.f32 0.3275911, %v1347_v48  ;;  %v1360_v1 = vsub.f32 0.0, %v1347_v48 }
 0x6e8   : > { %v1349_v51 = vadd.f32 1.0, %v1348_v50  ;;  %v1361_v52 = vmul.f32 %v1360_v1, %v1347_v48 }
 0x6ea   : > { %1900 = vrcp.f32 %v1349_v51  ;;  %v1362_v55 = vmul.f32 1.442695, %v1361_v52 }
 0x6ec   : > { %1902 = vpow2.f32 %v1362_v55 }
 0x6f7   : > { %v1901_v53 = vpop.eup %1900 }
 0x6f8   : > { %v1351_v54 = vmul.f32 1.0614054, %v1901_v53 }
 0x6f9   : > { %v1903_v0 = vpop.eup %1902 }
 0x6fa   : > { %v1352_v56 = vadd.f32 -1.4531521, %v1351_v54 }
 0x6fc   : > { %v1353_v57 = vmul.f32 %v1901_v53, %v1352_v56 }
 0x6fe   : > { %v1354_v58 = vadd.f32 1.4214138, %v1353_v57 }
 0x700   : > { %v1355_v59 = vmul.f32 %v1901_v53, %v1354_v58 }
 0x702   : > { %v1356_v60 = vadd.f32 -0.28449672, %v1355_v59 }
 0x704   : > { %v1357_v61 = vmul.f32 %v1901_v53, %v1356_v60 }
 0x706   : > { %v1358_v62 = vadd.f32 0.2548296, %v1357_v61 }
 0x708   : > { %v1359_v63 = vmul.f32 %v1901_v53, %v1358_v62 }
 0x70a   : > { %v1364_v2 = vmul.f32 %v1903_v0, %v1359_v63 }
 0x70c   : > { %v1365_v3 = vsub.f32 1.0, %v1364_v2 }
 0x70e   : > { %v1367_v4 = vsub.f32 0.0, %v1365_v3 }
 0x710   : > { %v1368_v5 = vsel %vm1366_vm7, %v1365_v3, %v1367_v4 }
 0x711   : > { %v1369_v8 = vadd.f32 1.0, %v1368_v5 }
 0x713   : > { %v1370_v9 = vmul.f32 %v1369_v8, %v1345_v7 }
 0x715   : > { %v1371_v10 = vpack.c.bf16 %v1370_v9, %v1370_v9 }
 0x717   : > { %1796 = vmatmul.mubr.bf16.vlgmr.msra.gmra.mxu0 %v1371_v10 }
 0x7d7   : > { %v1477_v12 = vpop.f32.mrf.mxu0 }
 0x7d8   : > { %v1478_v13 = vadd.f32 %v1646_v11, %v1477_v12 }
 0x7d9   : > { %v1797_v14 = vpop.f32.mrf.mxu0 }
 0x7da   : > { %v1483_v15 = vadd.f32 %v1478_v13, %v2275_v32 }
 0x7db   : > { %v1480_v16 = vpop.f32.mrf.mxu0 }
 0x7dc   : > { %v1486_v17 = vsel %vm574_vm1, %v1483_v15, 0.0 }
 0x7dd   : > { %1487 = vadd.xlane.f32.xlu0 %v1486_v17  ;;  %v1798_v18 = vpop.f32.mrf.mxu0 }
 0x866   : > { %v1488_v19 = vpop.xlane.xlu0 %1487 }
 0x867   : > { %v1489_v20 = vmul.f32 0.03125, %v1488_v19 }
 0x869   : > { %v1490_v21 = vsub.f32 %v1483_v15, %v1489_v20 }
 0x86b   : > { %v1491_v22 = vmul.f32 %v1490_v21, %v1490_v21 }
 0x86d   : > { %v1492_v6 = vsel %vm574_vm1, %v1491_v22, 0.0 }
 0x86e   : > { %1493 = vadd.xlane.f32.xlu1 %v1492_v6 }
 0x8f7   : > { %v1494_v23 = vpop.xlane.xlu1 %1493 }
 0x8f8   : > { %v1495_v24 = vmul.f32 0.03125, %v1494_v23 }
 0x8fa   : > { %v1496_v25 = vadd.f32 1e-12, %v1495_v24 }
 0x8fc   : > { %1904 = vrsqrt.f32 %v1496_v25 }
 0x909   : > { %v1905_v26 = vpop.eup %1904 }
 0x90a   : > { %v1498_v28 = vmul.f32 %v1905_v26, %v1490_v21 }
 0x90c   : > { %v1505_v30 = vmul.f32 %v1655_v27, %v1498_v28 }
 0x90e   : > { %v1512_v31 = vadd.f32 %v1656_v29, %v1505_v30 }
 0x910   : > { %1513 = vst.msk [vmem:[%s537_s20] sm:$0xff] %vm574_vm1, %v1512_v31 }
 0x911   : > { %1919 = shalt.err (!%p1916_p5)
}
 0x912   : > { %s1920_s1 = scalar_lea.hbm %s1527_s2, 128  ;;  %s1924_s29 = scalar_lea.hbm %s2382_s16, 256 }
 0x913   : > { %p1921_p6 = scmp.ne.s32.totalorder %s1527_s2, %s1920_s1  ;;  %p1925_p10 = scmp.lt.s32.totalorder %s1527_s2, %s2382_s16 }
 0x914   : > { %p1926_p11 = scmp.lt.s32.totalorder %s1924_s29, %s1920_s1 }
 0x915   : > { %p1922_p7 = pnand %p1921_p6, %p2119_p4 }
 0x916   : > { %p1927_p12 = por %p1926_p11, %p1925_p10 }
 0x917   : > { %p1923_p9 = pneg %p1922_p7 }
 0x919   : > { %p1928_p13 = pnand %p1927_p12, %p1923_p9 }
 0x91b   : > { %1931 = shalt.err (!%p1928_p13)
}
 0x91c   : > { %1799 = dma.vmem_to_hbm [thread:$0]  (%p2119_p4), %s1530_s27, 128, %s1527_s2, %s1515_s3  }
 0x91d PF: > { %p1805_p0 = scmp.ge.s32.totalorder %s1982_s26, 2  ;;  %s1541_s28 = sand.u32 1, %s1962_s21  }
 0x91e   : > { %s1542_s23 = scalar_lea.sflag [#allocation7], %s1541_s28 }
 0x91f   : > { %p1802_p1 = pnand %p1805_p0, %p2126_p8 }
 0x921   : > { %p1803_p2 = pneg %p1802_p1 }
 0x923   : > { %1957 = dma.done.wait (%p1803_p2), %s1542_s23, 128  }
 0x924   : > { %1959 = vsyncadd (%p1803_p2), %s1542_s23, 4294967168  ;;  %s29_s26 = sadd.s32 1, %s1982_s26   ;;  %s2402_s30 = sld [smem:[#allocation9_spill]] }
 0x925   : > { %p26_p3 = scmp.ge.s32.totalorder %s29_s26, 4   ;;  %s2403_s23 = sld [smem:[#allocation12_spill]] }
 0x926   : > { %s2404_s24 = sld [smem:[#allocation10_spill]]  ;;  %s2406_s21 = smov %s1966_s22 }
 0x927   : > { %s2405_s25 = sld [smem:[#allocation11_spill]]  ;;  %28 = sbr.rel (!%p26_p3) target bundleno = 10 (0xa), region = 127 }
 0x92a   : > { %s2407_s22 = smov %s2402_s30 }
 0x92c   :  { %1547 = vsyncpa [#allocation7], 1 }
 0x92d   :  { %1549 = vsyncpa [#allocation7 + $0x1], 1 }

// kernel: tpu_custom_call.1
= control target key start
LH: loop header
LB: loop body
LE: loop exit
PB: predicated region body
PF: predicated region fallthrough
CT: control target
= control target key end

     0   :  { %s2366_s0 = inlined_call_operand.vmem [shape: bf16[2,8,32], index: 0, kind: input, shape index: {}]   ;;  %s2367_s1 = inlined_call_operand.vmem [shape: f32[2,1,8], index: 1, kind: input, shape index: {}]   ;;  %s2368_s2 = inlined_call_operand.vmem [shape: bf16[32,32], index: 2, kind: input, shape index: {}]   ;;  %s2369_s3 = inlined_call_operand.vmem [shape: f32[1,32], index: 3, kind: input, shape index: {}]   ;;  %s2370_s4 = inlined_call_operand.vmem [shape: bf16[32,64], index: 4, kind: input, shape index: {}]   ;;  %s2371_s5 = inlined_call_operand.vmem [shape: f32[1,64], index: 5, kind: input, shape index: {}]   ;;  %s2372_s6 = inlined_call_operand.vmem [shape: bf16[32,32], index: 6, kind: input, shape index: {}]   ;;  %s2373_s7 = inlined_call_operand.vmem [shape: f32[1,32], index: 7, kind: input, shape index: {}]   ;;  %s2374_s8 = inlined_call_operand.vmem [shape: f32[1,32], index: 8, kind: input, shape index: {}]   ;;  %s2375_s9 = inlined_call_operand.vmem [shape: f32[1,32], index: 9, kind: input, shape index: {}]   ;;  %s2376_s10 = inlined_call_operand.vmem [shape: bf16[32,128], index: 10, kind: input, shape index: {}]   ;;  %s2377_s11 = inlined_call_operand.vmem [shape: f32[1,128], index: 11, kind: input, shape index: {}]   ;;  %s2378_s12 = inlined_call_operand.vmem [shape: bf16[128,32], index: 12, kind: input, shape index: {}]   ;;  %s2379_s13 = inlined_call_operand.vmem [shape: f32[1,32], index: 13, kind: input, shape index: {}]   ;;  %s2380_s14 = inlined_call_operand.vmem [shape: f32[1,32], index: 14, kind: input, shape index: {}]   ;;  %s2381_s15 = inlined_call_operand.vmem [shape: f32[1,32], index: 15, kind: input, shape index: {}]   ;;  %s2382_s16 = inlined_call_operand.hbm [shape: f32[2,8,32], index: 16, kind: output, shape index: {}]  }
   0x1   :  { %2386 = sst [smem:[#allocation13_spill]] %s2366_s0 }
   0x2   :  { %2387 = sst [smem:[#allocation14_spill]] %s2367_s1 }
   0x3   :  { %2388 = sst [smem:[#allocation15_spill]] %s2368_s2 }
   0x4   :  { %2389 = sst [smem:[#allocation16_spill]] %s2369_s3 }
   0x5   :  { %2390 = sst [smem:[#allocation17_spill]] %s2370_s4 }
   0x6   :  { %21 = vsyncpa [#allocation7], 0 }
   0x7   :  { %23 = vsyncpa [#allocation7 + $0x1], 0  ;;  %s2079_s21 = smov 0   ;;  %s2081_s22 = smov 0  }
   0x8   :  { %s2083_s23 = smov 0   ;;  %s2085_s24 = smov 0  }
   0x9   :  { %s2087_s25 = smov 0   ;;  %s2089_s26 = smov 0  }
   0xa LB: > { %2391 = sst [smem:[#allocation9_spill]] %s1970_s23  ;;  %s1608_s27 = sadd.s32 4294967295, %s1982_s26   ;;  %s1982_s26 = sphi %s2089_s26, %s29_s26   ;;  %s1978_s25 = sphi %s2087_s25, %s2405_s25   ;;  %s1974_s24 = sphi %s2085_s24, %s2404_s24   ;;  %s1970_s23 = sphi %s2083_s23, %s2403_s23   ;;  %s1966_s22 = sphi %s2081_s22, %s2407_s22   ;;  %s1962_s21 = sphi %s2079_s21, %s2406_s21  }
   0xb   : > { %2392 = sst [smem:[#allocation10_spill]] %s1978_s25  ;;  %s1609_s28 = sadd.s32 4294967294, %s1982_s26  }
   0xc   : > { %s41_s29 = sadd.s32 1, %s1978_s25  ;;  %s396_s30 = sadd.s32 1, %s1970_s23 }
   0xd   : > { %p43_p0 = scmp.ge.s32.totalorder %s41_s29, 2  ;;  %p406_p1 = scmp.ne.s32.totalorder %s1970_s23, %s1966_s22 }
   0xe   : > { %p407_p2 = scmp.eq.s32.totalorder %s1608_s27, 1  ;;  %p412_p3 = scmp.ne.s32.totalorder %s1966_s22, %s1962_s21 }
   0xf   : > { %s2409_s29 = smov (%p43_p0, %s41_s29), 0  ;;  %p413_p5 = scmp.eq.s32.totalorder %s1609_s28, 1 }
  0x10   : > { %2393 = sst [smem:[#allocation11_spill]] %s2409_s29  ;;  %p2119_p4 = por %p407_p2, %p406_p1 }
  0x11   : > { %s391_s17 = ssub.s32 %s1978_s25, %s2409_s29  ;;  %p1612_p6 = scmp.ge.s32.totalorder %s1982_s26, 1 }
  0x12   : > { %p394_p7 = scmp.eq.s32.totalorder %s391_s17, 0  ;;  %p2126_p8 = por %p413_p5, %p412_p3 }
  0x13   : > { %p486_p9 = scmp.lt.s32.totalorder %s1982_s26, 3 }
  0x14   : > { %s2132_s19 = scalar_select %p394_p7, %s1970_s23, %s396_s30  }
  0x15   : > { %p487_p10 = pnand %p1612_p6, %p486_p9 }
  0x16   : > { %2396 = sst [smem:[#allocation12_spill]] %s2132_s19  ;;  %p538_p11 = scmp.lt.s32.totalorder (!%p487_p10), %s1974_s24, 1 }
  0x17   : > { %490 = sbr.rel (%p487_p10) target bundleno = 2333 (0x91d), region = 84  ;;  %s2397_s4 = sld [smem:[#allocation17_spill]] (!%p487_p10) }
  0x18   : > { %s2398_s2 = sld [smem:[#allocation15_spill]] (!%p487_p10)  ;;  %s1986_s19 = smov (!%p487_p10), 112  }
  0x19   : > { %s2400_s3 = sld [smem:[#allocation16_spill]] (!%p487_p10)  ;;  %s1988_s27 = smov (!%p487_p10), 104  }
  0x1a   : > { %s1989_s28 = smov (!%p487_p10), 96   ;;  %s2401_s1 = sld [smem:[#allocation14_spill]] (!%p487_p10) }
  0x1b   : > { %s535_s17 = sand.u32 (!%p487_p10), 1, %s1966_s22  }
  0x1c   : > { %v1984_v1 = vmov 0.0   ;;  %vm1985_vm0 = vmmov 0   ;;  %s2149_s30 = scalar_select %p538_p11, %s1974_s24, 1  ;;  %vm574_vm1 = vcmask 261120   ;;  %v1615_v7 = vld [vmem:[%s2371_s5] ss:$0 sm:$0xff] }
  0x1d   : > { %v1863_v0 = vld [vmem:[%s2397_s4 + $0x8] sm:$0xff]   ;;  %1699 = vmatprep.subr.bf16.mxu1 %v1984_v1  ;;  %1727 = vmatprep.subr.bf16.mxu0 %v1984_v1  ;;  %v1864_v2 = vld [vmem:[%s2397_s4] sm:$0xff]   ;;  %s2399_s4 = sld [smem:[#allocation13_spill]]  ;;  %vm619_vm2 = vcmask 257024   ;;  %vm715_vm3 = vcmask 64512   ;;  %vm776_vm4 = vcmask 1043456  }
  0x1e   : > { %1700 = vmatpush3.bf16.msra.mxu1 %v1863_v0  ;;  %1703 = vmatprep.mubr.msk.bf16.mxu1 %vm1985_vm0, %v1984_v1  ;;  %s1614_s20 = sshll.u32 %s2149_s30, 2  ;;  %v1865_v3 = vld [vmem:[%s2398_s2 + $0x8] sm:$0xff]   ;;  %v1866_v5 = vld [vmem:[%s2398_s2] sm:$0xff]   ;;  %vm1173_vm5 = vcmask 130048   ;;  %vm1175_vm6 = vcmask 195584  }
  0x1f   : > { %1701 = vmatprep.subr.bf16.mxu1 %v1984_v1  ;;  %1729 = vmatprep.mubr.msk.bf16.mxu0 %vm1985_vm0, %v1984_v1  ;;  %v1620_v14 = vld [vmem:[%s2400_s3] ss:$0 sm:$0xff]  ;;  %s1515_s3 = scalar_lea.sflag [#allocation7], %s535_s17 }
  0x20   : > { %s544_s23 = scalar_lea.vmem %s2401_s1, %s2149_s30  ;;  %s1990_s30 = smov 8  }
  0x21   : > { %v1624_v39 = vld [vmem:[%s544_s23] ss:$0 sm:$0xff] }
  0x22   : > { %1702 = vmatpush3.bf16.msra.mxu1 %v1864_v2 }
  0x23   : > { %s541_s25 = scalar_lea.vmem %s2399_s4, %s1614_s20  ;;  %1707 = vmatprep.subr.bf16.mxu1 %v1984_v1  ;;  %s1987_s20 = smov 120  }
  0x24   : > { %v550_v4 = vld [vmem:[%s541_s25] sm:$0xf]  ;;  %s1613_s4 = sshll.u32 %s535_s17, 3 }
  0x25   : > { %1704 = vmatmul.mubr.msk.bf16.vlgmr.msra.gmra.mxu1 %vm574_vm1, %v550_v4  ;;  %v2166_v6 = vld [vmem:[%s541_s25] sm:$0xf] }
  0x26   : > { %1708 = vmatpush3.bf16.msra.mxu1 %v1865_v3  ;;  %1711 = vmatprep.mubr.msk.bf16.mxu1 %vm1985_vm0, %v1984_v1 }
  0x27   : > { %1709 = vmatprep.subr.bf16.mxu1 %v1984_v1 }
  0x2a   : > { %1710 = vmatpush3.bf16.msra.mxu1 %v1866_v5 }
  0x2b   : > { %1715 = vmatprep.subr.bf16.mxu1 %v1984_v1 }
  0x2d   : > { %1712 = vmatmul.mubr.msk.bf16.vlgmr.msra.gmra.mxu1 %vm574_vm1, %v2166_v6 }
  0x2e   : > { %1717 = vmatprep.mubr.msk.bf16.mxu1 %vm1985_vm0, %v1984_v1 }
  0xe5   : > { %v612_v8 = vpop.f32.mrf.mxu1 }
  0xe6   : > { %v613_v9 = vadd.f32 %v1615_v7, %v612_v8 }
  0xe7   : > { %v1705_v10 = vpop.f32.mrf.mxu1 }
  0xe8   : > { %v618_v11 = vpack.c.bf16 %v613_v9, %v613_v9 }
  0xe9   : > { %v615_v12 = vpop.f32.mrf.mxu1 }
  0xea   : > { %620 = vst.msk [vmem:[#allocation3] sm:$0xf] %vm619_vm2, %v618_v11 }
  0xeb   : > { %v1706_v13 = vpop.f32.mrf.mxu1 }
  0xed   : > { %v695_v15 = vpop.f32.mrf.mxu1 }
  0xee   : > { %v696_v16 = vadd.f32 %v1620_v14, %v695_v15 }
  0xef   : > { %v1713_v17 = vpop.f32.mrf.mxu1 }
  0xf0   : > { %v701_v18 = vmul.f32 0.35355338, %v696_v16 }
  0xf1   : > { %v698_v19 = vpop.f32.mrf.mxu1  ;;  %v713_v20 = vld [vmem:[#allocation3] sm:$0xf] }
  0xf2   : > { %v702_v21 = vpack.c.bf16 %v701_v18, %v701_v18  ;;  %v720_v22 = vsel %vm715_vm3, %v713_v20, 0  ;;  %v1628_v23 = vcombine.low %v713_v20, %v713_v20 }
  0xf3   : > { %v1714_v24 = vpop.f32.mrf.mxu1  ;;  %1716 = vmatpush3.bf16.xpose.msra.mxu1 %v720_v22 }
  0xf4   : > { %704 = vst.msk [vmem:[#allocation2] sm:$0xf] %vm619_vm2, %v702_v21  ;;  %942 = vrot.lane.b32.xlu1 %v1628_v23, %s1986_s19  ;;  %829 = vrot.lane.b32.xlu0 %v1628_v23, %s1987_s20 }
  0xf5   : > { %1721 = vmatprep.subr.bf16.mxu1 %v1984_v1 }
  0xfb   : > { %v712_v25 = vld [vmem:[#allocation2] sm:$0xf] }
  0xfc   : > { %1718 = vmatmul.mubr.msk.bf16.vlgmr.msra.gmra.mxu1 %vm715_vm3, %v712_v25  ;;  %v1627_v26 = vcombine.low %v712_v25, %v712_v25 }
  0xfd   : > { %1723 = vmatprep.mubr.msk.bf16.mxu1 %vm1985_vm0, %v1984_v1 }
  0xfe   : > { %940 = vrot.lane.b32.xlu1 %v1627_v26, %s1986_s19  ;;  %824 = vrot.lane.b32.xlu0 %v1627_v26, %s1987_s20 }
 0x102   : > { %1050 = vrot.lane.b32.xlu1 %v1627_v26, %s1988_s27  ;;  %1052 = vrot.lane.b32.xlu0 %v1628_v23, %s1988_s27 }
 0x106   : > { %624 = vrot.lane.b32.xlu0 %v618_v11, %s1989_s28  ;;  %s1992_s28 = smov 24  }
 0x166   : > { %v830_v27 = vpop.permute.xlu0 %829  ;;  %v943_v29 = vpop.permute.xlu1 %942 }
 0x167   : > { %v835_v28 = vsel %vm715_vm3, %v830_v27, 0  ;;  %v948_v31 = vsel %vm715_vm3, %v943_v29, 0 }
 0x168   : > { %1728 = vmatpush3.bf16.xpose.msra.mxu0 %v835_v28 }
 0x169   : > { %1739 = vmatprep.subr.bf16.mxu0 %v1984_v1 }
 0x170   : > { %v825_v30 = vpop.permute.xlu0 %824  ;;  %v941_v33 = vpop.permute.xlu1 %940 }
 0x171   : > { %1730 = vmatmul.mubr.msk.bf16.vlgmr.msra.gmra.mxu0 %vm715_vm3, %v825_v30 }
 0x172   : > { %1740 = vmatpush3.bf16.xpose.msra.mxu0 %v948_v31  ;;  %1741 = vmatprep.mubr.msk.bf16.mxu0 %vm1985_vm0, %v1984_v1 }
 0x173   : > { %1751 = vmatprep.subr.bf16.mxu0 %v1984_v1 }
 0x174   : > { %v1053_v32 = vpop.permute.xlu0 %1052  ;;  %v1051_v36 = vpop.permute.xlu1 %1050 }
 0x175   : > { %v1058_v35 = vsel %vm715_vm3, %v1053_v32, 0 }
 0x178   : > { %v625_v34 = vpop.permute.xlu0 %624 }
 0x179   : > { %627 = vst.msk [vmem:[#allocation4] sm:$0xf] %vm619_vm2, %v625_v34  ;;  %1742 = vmatmul.mubr.msk.bf16.vlgmr.msra.gmra.mxu0 %vm715_vm3, %v941_v33 }
 0x17a   : > { %1752 = vmatpush3.bf16.xpose.msra.mxu0 %v1058_v35  ;;  %1753 = vmatprep.mubr.msk.bf16.mxu0 %vm1985_vm0, %v1984_v1 }
 0x17b   : > { %1763 = vmatprep.subr.bf16.mxu0 %v1984_v1 }
 0x180   : > { %v714_v37 = vld [vmem:[#allocation4] sm:$0xf] }
 0x181   : > { %1754 = vmatmul.mubr.msk.bf16.vlgmr.msra.gmra.mxu0 %vm715_vm3, %v1051_v36  ;;  %v778_v38 = vsel %vm776_vm4, %v714_v37, 0  ;;  %v1630_v46 = vcombine.low %v714_v37, %v714_v37 }
 0x182   : > { %1722 = vmatpush3.bf16.msra.mxu1 %v778_v38  ;;  %1767 = vmatprep.mubr.msk.bf16.mxu0 %vm1985_vm0, %v1984_v1 }
 0x183   : > { %1733 = vmatprep.subr.bf16.mxu1 %v1984_v1 }
 0x1bc   : > { %v756_v40 = vpop.f32.mrf.mxu1 }
 0x1bd   : > { %v757_v41 = vadd.f32 %v1624_v39, %v756_v40 }
 0x1be   : > { %v1719_v42 = vpop.f32.mrf.mxu1 }
 0x1bf   : > { %v762_v43 = vsel %vm715_vm3, %v757_v41, -inf }
 0x1c0   : > { %763 = vmax.xlane.f32.xlu1 %v762_v43  ;;  %v759_v44 = vpop.f32.mrf.mxu1 }
 0x1c2   : > { %v1720_v45 = vpop.f32.mrf.mxu1 }
 0x1d1   : > { %1001 = vrot.lane.b32.xlu1 %v1630_v46, %s1986_s19  ;;  %s1991_s19 = smov 16  }
 0x231   : > { %v871_v47 = vpop.f32.mrf.mxu0 }
 0x232   : > { %v872_v48 = vadd.f32 %v1624_v39, %v871_v47 }
 0x233   : > { %v1731_v49 = vpop.f32.mrf.mxu0 }
 0x234   : > { %v877_v50 = vsel %vm715_vm3, %v872_v48, -inf  ;;  %v1870_v49 = vld [vmem:[%s2372_s6 + $0x8] sm:$0xff]  }
 0x235   : > { %878 = vmax.xlane.f32.xlu0 %v877_v50  ;;  %v874_v51 = vpop.f32.mrf.mxu0  ;;  %1764 = vmatpush3.bf16.msra.mxu0 %v1870_v49 }
 0x236   : > { %v1871_v51 = vld [vmem:[%s2372_s6] sm:$0xff]   ;;  %1765 = vmatprep.subr.bf16.mxu0 %v1984_v1 }
 0x237   : > { %v1732_v52 = vpop.f32.mrf.mxu0 }
 0x239   : > { %v984_v53 = vpop.f32.mrf.mxu0  ;;  %1766 = vmatpush3.bf16.msra.mxu0 %v1871_v51 }
 0x23a   : > { %v985_v54 = vadd.f32 %v1624_v39, %v984_v53  ;;  %1779 = vmatprep.subr.bf16.mxu0 %v1984_v1 }
 0x23b   : > { %v1743_v55 = vpop.f32.mrf.mxu0 }
 0x23c   : > { %v990_v56 = vsel %vm715_vm3, %v985_v54, -inf }
 0x23d   : > { %991 = vmax.xlane.f32.xlu0 %v990_v56  ;;  %v987_v57 = vpop.f32.mrf.mxu0 }
 0x23f   : > { %v1744_v58 = vpop.f32.mrf.mxu0 }
 0x241   : > { %v1094_v59 = vpop.f32.mrf.mxu0 }
 0x242   : > { %v1095_v60 = vadd.f32 %v1624_v39, %v1094_v59 }
 0x243   : > { %v1755_v61 = vpop.f32.mrf.mxu0 }
 0x244   : > { %v1100_v62 = vsel %vm715_vm3, %v1095_v60, -inf }
 0x245   : > { %v1097_v63 = vpop.f32.mrf.mxu0  ;;  %1101 = vmax.xlane.f32.xlu1 %v1100_v62 }
 0x247   : > { %v1756_v0 = vpop.f32.mrf.mxu0 }
 0x249   : > { %v764_v2 = vpop.xlane.xlu1 %763 }
 0x24a   : > { %v765_v3 = vsub.f32 %v757_v41, %v764_v2 }
 0x24c   : > { %v766_v4 = vmul.f32 1.442695, %v765_v3 }
 0x24d   : > { %v1002_v14 = vpop.permute.xlu1 %1001 }
 0x24e   : > { %1882 = vpow2.f32 %v766_v4  ;;  %v1007_v23 = vsel %vm776_vm4, %v1002_v14, 0 }
 0x253   : > { %891 = vrot.lane.b32.xlu0 %v1630_v46, %s1987_s20  ;;  %s537_s20 = scalar_lea.vmem [#allocation6], %s1613_s4 }
 0x256   : > { %1111 = vrot.lane.b32.xlu1 %v1630_v46, %s1988_s27  ;;  %s1529_s27 = sshll.u32 %s537_s20, 4  ;;  %s1530_s27 = int_to_ptr.vmem [resolvable:$true] %s1529_s27 }
 0x257   : > { %s1906_s23 = scalar_lea.vmem %s1530_s27, 128 }
 0x258   : > { %p1907_p12 = scmp.ne.s32.totalorder %s1530_s27, %s1906_s23 }
 0x25a   : > { %p1908_p13 = pnand %p1907_p12, %p2119_p4 }
 0x25b   : > { %v1883_v5 = vpop.eup %1882 }
 0x25c   : > { %v772_v7 = vpack.c.bf16 %v1883_v5, %v1883_v5  ;;  %v768_v32 = vsel %vm715_vm3, %v1883_v5, 0.0  ;;  %p1909_p0 = pneg %p1908_p13 }
 0x25e   : > { %1724 = vmatmul.mubr.msk.bf16.vlgmr.msra.gmra.mxu1 %vm715_vm3, %v772_v7 }
 0x25f   : > { %1735 = vmatprep.mubr.msk.bf16.mxu1 %vm1985_vm0, %v1984_v1 }
 0x2be   : > { %v879_v8 = vpop.xlane.xlu0 %878 }
 0x2bf   : > { %v880_v9 = vsub.f32 %v872_v48, %v879_v8 }
 0x2c1   : > { %v881_v10 = vmul.f32 1.442695, %v880_v9  ;;  %v1636_v9 = vld [vmem:[%s2373_s7] ss:$0 sm:$0xff] }
 0x2c3   : > { %1884 = vpow2.f32 %v881_v10  ;;  %v1246_v10 = vunpack.c.l.bf16 %v2166_v6  ;;  %v1872_v6 = vld [vmem:[%s2376_s10 + $0x8] sm:$0xff]  }
 0x2c6   : > { %v992_v11 = vpop.xlane.xlu0 %991 }
 0x2c7   : > { %v993_v12 = vsub.f32 %v985_v54, %v992_v11 }
 0x2c9   : > { %v994_v13 = vmul.f32 1.442695, %v993_v12 }
 0x2ca   : > { %v892_v15 = vpop.permute.xlu0 %891 }
 0x2cb   : > { %1886 = vpow2.f32 %v994_v13  ;;  %v897_v16 = vsel %vm776_vm4, %v892_v15, 0 }
 0x2cc   : > { %1734 = vmatpush3.bf16.msra.mxu1 %v897_v16 }
 0x2cd   : > { %1745 = vmatprep.subr.bf16.mxu1 %v1984_v1 }
 0x2ce   : > { %v1102_v17 = vpop.xlane.xlu1 %1101 }
 0x2cf   : > { %v1103_v18 = vsub.f32 %v1095_v60, %v1102_v17 }
 0x2d0   : > { %v1885_v19 = vpop.eup %1884 }
 0x2d1   : > { %v1104_v20 = vmul.f32 1.442695, %v1103_v18  ;;  %v883_v21 = vsel %vm715_vm3, %v1885_v19, 0.0  ;;  %v887_v22 = vpack.c.bf16 %v1885_v19, %v1885_v19 }
 0x2d2   : > { %884 = vadd.xlane.f32.xlu0 %v883_v21  ;;  %v1112_v25 = vpop.permute.xlu1 %1111 }
 0x2d3   : > { %1888 = vpow2.f32 %v1104_v20  ;;  %1736 = vmatmul.mubr.msk.bf16.vlgmr.msra.gmra.mxu1 %vm715_vm3, %v887_v22  ;;  %v1117_v28 = vsel %vm776_vm4, %v1112_v25, 0 }
 0x2d4   : > { %1746 = vmatpush3.bf16.msra.mxu1 %v1007_v23  ;;  %1747 = vmatprep.mubr.msk.bf16.mxu1 %vm1985_vm0, %v1984_v1  ;;  %v1873_v23 = vld [vmem:[%s2376_s10] sm:$0xff]  }
 0x2d5   : > { %1757 = vmatprep.subr.bf16.mxu1 %v1984_v1 }
 0x2d8   : > { %v1887_v24 = vpop.eup %1886 }
 0x2d9   : > { %v996_v26 = vsel %vm715_vm3, %v1887_v24, 0.0  ;;  %v1000_v27 = vpack.c.bf16 %v1887_v24, %v1887_v24 }
 0x2da   : > { %997 = vadd.xlane.f32.xlu1 %v996_v26 }
 0x2db   : > { %1748 = vmatmul.mubr.msk.bf16.vlgmr.msra.gmra.mxu1 %vm715_vm3, %v1000_v27 }
 0x2dc   : > { %1758 = vmatpush3.bf16.msra.mxu1 %v1117_v28  ;;  %1759 = vmatprep.mubr.msk.bf16.mxu1 %vm1985_vm0, %v1984_v1  ;;  %v1640_v28 = vld [vmem:[%s2374_s8] ss:$0 sm:$0xff] }
 0x2dd   : > { %1771 = vmatprep.subr.bf16.mxu1 %v1984_v1 }
 0x2e0   : > { %v1889_v29 = vpop.eup %1888 }
 0x2e1   : > { %v1106_v30 = vsel %vm715_vm3, %v1889_v29, 0.0  ;;  %v1110_v31 = vpack.c.bf16 %v1889_v29, %v1889_v29 }
 0x2e2   : > { %1107 = vadd.xlane.f32.xlu0 %v1106_v30  ;;  %v1641_v30 = vld [vmem:[%s2375_s9] ss:$0 sm:$0xff] }
 0x2e3   : > { %1760 = vmatmul.mubr.msk.bf16.vlgmr.msra.gmra.mxu1 %vm715_vm3, %v1110_v31 }
 0x2e4   : > { %1775 = vmatprep.mubr.msk.bf16.mxu1 %vm1985_vm0, %v1984_v1  ;;  %1772 = vmatpush3.bf16.msra.mxu1 %v1872_v6 }
 0x2e5   : > { %1773 = vmatprep.subr.bf16.mxu1 %v1984_v1 }
 0x2e6   : > { %769 = vadd.xlane.f32.xlu0 %v768_v32 }
 0x2e8   : > { %1774 = vmatpush3.bf16.msra.mxu1 %v1873_v23 }
 0x31e   : > { %v814_v33 = vpop.f32.mrf.mxu1 }
 0x320   : > { %v1725_v34 = vpop.f32.mrf.mxu1 }
 0x321   : > { %v1874_v34 = vld [vmem:[%s2378_s12 + $0x38] sm:$0xff]  }
 0x322   : > { %v817_v35 = vpop.f32.mrf.mxu1 }
 0x323   : > { %v1875_v35 = vld [vmem:[%s2378_s12 + $0x30] sm:$0xff]  }
 0x324   : > { %v1726_v36 = vpop.f32.mrf.mxu1 }
 0x325   : > { %v1876_v36 = vld [vmem:[%s2378_s12 + $0x28] sm:$0xff]  }
 0x35b   : > { %v885_v37 = vpop.xlane.xlu0 %884 }
 0x35c   : > { %1890 = vrcp.f32 %v885_v37  ;;  %v1877_v37 = vld [vmem:[%s2378_s12 + $0x20] sm:$0xff]  }
 0x363   : > { %v998_v38 = vpop.xlane.xlu1 %997 }
 0x364   : > { %1892 = vrcp.f32 %v998_v38  ;;  %v1878_v38 = vld [vmem:[%s2378_s12 + $0x18] sm:$0xff]  }
 0x369   : > { %v1891_v39 = vpop.eup %1890 }
 0x36b   : > { %v1108_v40 = vpop.xlane.xlu0 %1107 }
 0x36c   : > { %1894 = vrcp.f32 %v1108_v40  ;;  %v1880_v40 = vld [vmem:[%s2378_s12 + $0x8] sm:$0xff]  }
 0x36f   : > { %v770_v60 = vpop.xlane.xlu0 %769 }
 0x370   : > { %1896 = vrcp.f32 %v770_v60 }
 0x371   : > { %v1893_v46 = vpop.eup %1892 }
 0x379   : > { %v1895_v54 = vpop.eup %1894 }
 0x37d   : > { %v1897_v61 = vpop.eup %1896 }
 0x37e   : > { %v820_v63 = vmul.f32 %v1897_v61, %v814_v33 }
 0x393   : > { %v933_v41 = vpop.f32.mrf.mxu1 }
 0x394   : > { %v939_v42 = vmul.f32 %v1891_v39, %v933_v41  ;;  %v1879_v39 = vld [vmem:[%s2378_s12 + $0x10] sm:$0xff]   ;;  %v1881_v41 = vld [vmem:[%s2378_s12] sm:$0xff]  }
 0x395   : > { %v1737_v43 = vpop.f32.mrf.mxu1 }
 0x396   : > { %1161 = vrot.lane.b32.xlu1 %v939_v42, %s1990_s30  ;;  %v1642_v42 = vld [vmem:[%s2377_s11] ss:$0 sm:$0xff]  ;;  %s1993_s30 = smov [#allocation6]  }
 0x397   : > { %v936_v44 = vpop.f32.mrf.mxu1  ;;  %s1910_s25 = sshll.u32 %s1993_s30, 4  ;;  %s1911_s25 = int_to_ptr.vmem [resolvable:$false] %s1910_s25 }
 0x398   : > { %p1913_p1 = scmp.lt.s32.totalorder %s1530_s27, %s1911_s25 }
 0x399   : > { %v1738_v45 = vpop.f32.mrf.mxu1 }
 0x39b   : > { %v1043_v47 = vpop.f32.mrf.mxu1 }
 0x39c   : > { %v1049_v48 = vmul.f32 %v1893_v46, %v1043_v47 }
 0x39d   : > { %v1749_v50 = vpop.f32.mrf.mxu1 }
 0x39e   : > { %1165 = vrot.lane.b32.xlu0 %v1049_v48, %s1991_s19  ;;  %s1658_s19 = sshll.u32 %s1974_s24, 7  ;;  %s1912_s24 = scalar_lea.vmem %s1911_s25, 256 }
 0x39f   : > { %v1046_v52 = vpop.f32.mrf.mxu1  ;;  %s1527_s2 = scalar_lea.hbm %s2382_s16, %s1658_s19  ;;  %p1914_p2 = scmp.lt.s32.totalorder %s1912_s24, %s1906_s23 }
 0x3a1   : > { %v1750_v53 = vpop.f32.mrf.mxu1  ;;  %p1915_p3 = por %p1914_p2, %p1913_p1 }
 0x3a3   : > { %v1153_v55 = vpop.f32.mrf.mxu1  ;;  %p1916_p5 = pnand %p1915_p3, %p1909_p0 }
 0x3a4   : > { %v1159_v56 = vmul.f32 %v1895_v54, %v1153_v55 }
 0x3a5   : > { %v1761_v57 = vpop.f32.mrf.mxu1 }
 0x3a6   : > { %1169 = vrot.lane.b32.xlu1 %v1159_v56, %s1992_s28 }
 0x3a7   : > { %v1156_v58 = vpop.f32.mrf.mxu1 }
 0x3a9   : > { %v1762_v59 = vpop.f32.mrf.mxu1 }
 0x408   : > { %v1162_v62 = vpop.permute.xlu1 %1161 }
 0x409   : > { %v1172_v2 = vsel %vm715_vm3, %v820_v63, %v1162_v62 }
 0x410   : > { %v1166_v0 = vpop.permute.xlu0 %1165 }
 0x411   : > { %v1174_v3 = vsel %vm1173_vm5, %v1172_v2, %v1166_v0 }
 0x418   : > { %v1170_v4 = vpop.permute.xlu1 %1169 }
 0x419   : > { %v1176_v5 = vsel %vm1175_vm6, %v1174_v3, %v1170_v4 }
 0x41a   : > { %v1177_v7 = vpack.c.bf16 %v1176_v5, %v1176_v5 }
 0x41c   : > { %1178 = vst.msk [vmem:[#allocation5] sm:$0xf] %vm619_vm2, %v1177_v7 }
 0x423   : > { %v1179_v8 = vld [vmem:[#allocation5] sm:$0xf] }
 0x424   : > { %1768 = vmatmul.mubr.msk.bf16.vlgmr.msra.gmra.mxu0 %vm574_vm1, %v1179_v8 }
 0x425   : > { %1795 = vmatprep.mubr.msk.bf16.mxu0 %vm1985_vm0, %v1984_v1  ;;  %1780 = vmatpush3.bf16.msra.mxu0 %v1874_v34 }
 0x426   : > { %1781 = vmatprep.subr.bf16.mxu0 %v1984_v1 }
 0x429   : > { %1782 = vmatpush3.bf16.msra.mxu0 %v1875_v35 }
 0x42a   : > { %1783 = vmatprep.subr.bf16.mxu0 %v1984_v1 }
 0x42d   : > { %1784 = vmatpush3.bf16.msra.mxu0 %v1876_v36 }
 0x42e   : > { %1785 = vmatprep.subr.bf16.mxu0 %v1984_v1 }
 0x431   : > { %1786 = vmatpush3.bf16.msra.mxu0 %v1877_v37 }
 0x432   : > { %1787 = vmatprep.subr.bf16.mxu0 %v1984_v1 }
 0x435   : > { %1788 = vmatpush3.bf16.msra.mxu0 %v1878_v38 }
 0x436   : > { %1789 = vmatprep.subr.bf16.mxu0 %v1984_v1 }
 0x439   : > { %1790 = vmatpush3.bf16.msra.mxu0 %v1879_v39 }
 0x43a   : > { %1791 = vmatprep.subr.bf16.mxu0 %v1984_v1 }
 0x43d   : > { %1792 = vmatpush3.bf16.msra.mxu0 %v1880_v40 }
 0x43e   : > { %1793 = vmatprep.subr.bf16.mxu0 %v1984_v1 }
 0x441   : > { %1794 = vmatpush3.bf16.msra.mxu0 %v1881_v41 }
 0x4e4   : > { %v1240_v11 = vpop.f32.mrf.mxu0 }
 0x4e5   : > { %v1241_v12 = vadd.f32 %v1636_v9, %v1240_v11  ;;  %v1646_v11 = vld [vmem:[%s2379_s13] ss:$0 sm:$0xff] }
 0x4e6   : > { %v1769_v13 = vpop.f32.mrf.mxu0 }
 0x4e7   : > { %v1247_v14 = vadd.f32 %v1246_v10, %v1241_v12 }
 0x4e8   : > { %v1243_v15 = vpop.f32.mrf.mxu0 }
 0x4e9   : > { %v1250_v16 = vsel %vm574_vm1, %v1247_v14, 0.0 }
 0x4ea   : > { %1251 = vadd.xlane.f32.xlu1 %v1250_v16  ;;  %v1770_v17 = vpop.f32.mrf.mxu0 }
 0x573   : > { %v1252_v18 = vpop.xlane.xlu1 %1251 }
 0x574   : > { %v1254_v19 = vmul.f32 0.03125, %v1252_v18 }
 0x576   : > { %v1255_v20 = vsub.f32 %v1247_v14, %v1254_v19 }
 0x578   : > { %v1256_v21 = vmul.f32 %v1255_v20, %v1255_v20 }
 0x57a   : > { %v1257_v22 = vsel %vm574_vm1, %v1256_v21, 0.0 }
 0x57b   : > { %1258 = vadd.xlane.f32.xlu0 %v1257_v22 }
 0x604   : > { %v1259_v24 = vpop.xlane.xlu0 %1258 }
 0x605   : > { %v1260_v25 = vmul.f32 0.03125, %v1259_v24 }
 0x607   : > { %v1261_v26 = vadd.f32 1e-12, %v1260_v25 }
 0x609   : > { %1898 = vrsqrt.f32 %v1261_v26 }
 0x616   : > { %v1899_v27 = vpop.eup %1898 }
 0x617   : > { %v1263_v29 = vmul.f32 %v1899_v27, %v1255_v20  ;;  %v1655_v27 = vld [vmem:[%s2380_s14] ss:$0 sm:$0xff] }
 0x619   : > { %v1270_v31 = vmul.f32 %v1640_v28, %v1263_v29  ;;  %v1656_v29 = vld [vmem:[%s2381_s15] ss:$0 sm:$0xff] }
 0x61b   : > { %v2275_v32 = vadd.f32 %v1641_v30, %v1270_v31 }
 0x61d   : > { %v1278_v33 = vpack.c.bf16 %v2275_v32, %v2275_v32 }
 0x61f   : > { %1776 = vmatmul.mubr.msk.bf16.vlgmr.msra.gmra.mxu1 %vm574_vm1, %v1278_v33 }
 0x6df   : > { %v1339_v43 = vpop.f32.mrf.mxu1 }
 0x6e0   : > { %v1340_v44 = vadd.f32 %v1642_v42, %v1339_v43 }
 0x6e1   : > { %v1777_v45 = vpop.f32.mrf.mxu1 }
 0x6e2   : > { %v1346_v46 = vmul.f32 0.70710677, %v1340_v44  ;;  %v1345_v7 = vmul.f32 0.5, %v1340_v44 }
 0x6e3   : > { %v1342_v47 = vpop.f32.mrf.mxu1 }
 0x6e4   : > { %v1347_v48 = vand.u32 2147483647, %v1346_v46  ;;  %vm1366_vm7 = vcmp.ge.f32.partialorder %v1346_v46, 0.0 }
 0x6e5   : > { %v1778_v49 = vpop.f32.mrf.mxu1 }
 0x6e6   : > { %v1348_v50 = vmul.f32 0.3275911, %v1347_v48  ;;  %v1360_v1 = vsub.f32 0.0, %v1347_v48 }
 0x6e8   : > { %v1349_v51 = vadd.f32 1.0, %v1348_v50  ;;  %v1361_v52 = vmul.f32 %v1360_v1, %v1347_v48 }
 0x6ea   : > { %1900 = vrcp.f32 %v1349_v51  ;;  %v1362_v55 = vmul.f32 1.442695, %v1361_v52 }
 0x6ec   : > { %1902 = vpow2.f32 %v1362_v55 }
 0x6f7   : > { %v1901_v53 = vpop.eup %1900 }
 0x6f8   : > { %v1351_v54 = vmul.f32 1.0614054, %v1901_v53 }
 0x6f9   : > { %v1903_v0 = vpop.eup %1902 }
 0x6fa   : > { %v1352_v56 = vadd.f32 -1.4531521, %v1351_v54 }
 0x6fc   : > { %v1353_v57 = vmul.f32 %v1901_v53, %v1352_v56 }
 0x6fe   : > { %v1354_v58 = vadd.f32 1.4214138, %v1353_v57 }
 0x700   : > { %v1355_v59 = vmul.f32 %v1901_v53, %v1354_v58 }
 0x702   : > { %v1356_v60 = vadd.f32 -0.28449672, %v1355_v59 }
 0x704   : > { %v1357_v61 = vmul.f32 %v1901_v53, %v1356_v60 }
 0x706   : > { %v1358_v62 = vadd.f32 0.2548296, %v1357_v61 }
 0x708   : > { %v1359_v63 = vmul.f32 %v1901_v53, %v1358_v62 }
 0x70a   : > { %v1364_v2 = vmul.f32 %v1903_v0, %v1359_v63 }
 0x70c   : > { %v1365_v3 = vsub.f32 1.0, %v1364_v2 }
 0x70e   : > { %v1367_v4 = vsub.f32 0.0, %v1365_v3 }
 0x710   : > { %v1368_v5 = vsel %vm1366_vm7, %v1365_v3, %v1367_v4 }
 0x711   : > { %v1369_v8 = vadd.f32 1.0, %v1368_v5 }
 0x713   : > { %v1370_v9 = vmul.f32 %v1369_v8, %v1345_v7 }
 0x715   : > { %v1371_v10 = vpack.c.bf16 %v1370_v9, %v1370_v9 }
 0x717   : > { %1796 = vmatmul.mubr.bf16.vlgmr.msra.gmra.mxu0 %v1371_v10 }
 0x7d7   : > { %v1477_v12 = vpop.f32.mrf.mxu0 }
 0x7d8   : > { %v1478_v13 = vadd.f32 %v1646_v11, %v1477_v12 }
 0x7d9   : > { %v1797_v14 = vpop.f32.mrf.mxu0 }
 0x7da   : > { %v1483_v15 = vadd.f32 %v1478_v13, %v2275_v32 }
 0x7db   : > { %v1480_v16 = vpop.f32.mrf.mxu0 }
 0x7dc   : > { %v1486_v17 = vsel %vm574_vm1, %v1483_v15, 0.0 }
 0x7dd   : > { %1487 = vadd.xlane.f32.xlu0 %v1486_v17  ;;  %v1798_v18 = vpop.f32.mrf.mxu0 }
 0x866   : > { %v1488_v19 = vpop.xlane.xlu0 %1487 }
 0x867   : > { %v1489_v20 = vmul.f32 0.03125, %v1488_v19 }
 0x869   : > { %v1490_v21 = vsub.f32 %v1483_v15, %v1489_v20 }
 0x86b   : > { %v1491_v22 = vmul.f32 %v1490_v21, %v1490_v21 }
 0x86d   : > { %v1492_v6 = vsel %vm574_vm1, %v1491_v22, 0.0 }
 0x86e   : > { %1493 = vadd.xlane.f32.xlu1 %v1492_v6 }
 0x8f7   : > { %v1494_v23 = vpop.xlane.xlu1 %1493 }
 0x8f8   : > { %v1495_v24 = vmul.f32 0.03125, %v1494_v23 }
 0x8fa   : > { %v1496_v25 = vadd.f32 1e-12, %v1495_v24 }
 0x8fc   : > { %1904 = vrsqrt.f32 %v1496_v25 }
 0x909   : > { %v1905_v26 = vpop.eup %1904 }
 0x90a   : > { %v1498_v28 = vmul.f32 %v1905_v26, %v1490_v21 }
 0x90c   : > { %v1505_v30 = vmul.f32 %v1655_v27, %v1498_v28 }
 0x90e   : > { %v1512_v31 = vadd.f32 %v1656_v29, %v1505_v30 }
 0x910   : > { %1513 = vst.msk [vmem:[%s537_s20] sm:$0xff] %vm574_vm1, %v1512_v31 }
 0x911   : > { %1919 = shalt.err (!%p1916_p5)
}
 0x912   : > { %s1920_s1 = scalar_lea.hbm %s1527_s2, 128  ;;  %s1924_s29 = scalar_lea.hbm %s2382_s16, 256 }
 0x913   : > { %p1921_p6 = scmp.ne.s32.totalorder %s1527_s2, %s1920_s1  ;;  %p1925_p10 = scmp.lt.s32.totalorder %s1527_s2, %s2382_s16 }
 0x914   : > { %p1926_p11 = scmp.lt.s32.totalorder %s1924_s29, %s1920_s1 }
 0x915   : > { %p1922_p7 = pnand %p1921_p6, %p2119_p4 }
 0x916   : > { %p1927_p12 = por %p1926_p11, %p1925_p10 }
 0x917   : > { %p1923_p9 = pneg %p1922_p7 }
 0x919   : > { %p1928_p13 = pnand %p1927_p12, %p1923_p9 }
 0x91b   : > { %1931 = shalt.err (!%p1928_p13)
}
 0x91c   : > { %1799 = dma.vmem_to_hbm [thread:$0]  (%p2119_p4), %s1530_s27, 128, %s1527_s2, %s1515_s3  }
 0x91d PF: > { %p1805_p0 = scmp.ge.s32.totalorder %s1982_s26, 2  ;;  %s1541_s28 = sand.u32 1, %s1962_s21  }
 0x91e   : > { %s1542_s23 = scalar_lea.sflag [#allocation7], %s1541_s28 }
 0x91f   : > { %p1802_p1 = pnand %p1805_p0, %p2126_p8 }
 0x921   : > { %p1803_p2 = pneg %p1802_p1 }
 0x923   : > { %1957 = dma.done.wait (%p1803_p2), %s1542_s23, 128  }
 0x924   : > { %1959 = vsyncadd (%p1803_p2), %s1542_s23, 4294967168  ;;  %s29_s26 = sadd.s32 1, %s1982_s26   ;;  %s2402_s30 = sld [smem:[#allocation9_spill]] }
 0x925   : > { %p26_p3 = scmp.ge.s32.totalorder %s29_s26, 4   ;;  %s2403_s23 = sld [smem:[#allocation12_spill]] }
 0x926   : > { %s2404_s24 = sld [smem:[#allocation10_spill]]  ;;  %s2406_s21 = smov %s1966_s22 }
 0x927   : > { %s2405_s25 = sld [smem:[#allocation11_spill]]  ;;  %28 = sbr.rel (!%p26_p3) target bundleno = 10 (0xa), region = 127 }
 0x92a   : > { %s2407_s22 = smov %s2402_s30 }
 0x92c   :  { %1547 = vsyncpa [#allocation7], 1 }
 0x92d   :  { %1549 = vsyncpa [#allocation7 + $0x1], 1 }

</bundles_post_ra>
